<compile_context>
chip_gen: v7x
topology: tpu7x:2x2x1
jax: 0.10.0
libtpu: 0.0.40
codegen_flags: <defaults>
</compile_context>

<pallas_src>
import math

import jax
import jax.numpy as jnp
from jax import lax
from jax.experimental import pallas as pl
from jax.experimental.pallas import tpu as pltpu

# ----------------------------- config --------------------------------------
B, T_IMG, FRAMES = 2, 1, 1            # F = 1 (single-frame videos), T_img = 1
C, H, W, PATCH = 3, 16, 16, 8         # base_img_size = 16, 4 patches per image
D_VIS, VIS_HEADS = 32, 4              # vision encoder width
D_LANG, LM_HEADS = 32, 4              # lang_embedding_dim / lang_hidden_dim
MLP_MULT = 2
VOCAB = 48                            # initial_tokenizer_len
NUM_SPECIAL = 1                       # special_tokens = {"media_token": "<image>"}
PAD_ID = 0                            # pad_token_id
MEDIA_ID = VOCAB                      # first additional-embedding id
T_TXT = 8

CPP = C * PATCH * PATCH               # im2col patch length (C, ph, pw) order
N_IMG = T_IMG * FRAMES                # images per sample
NVIS_PER_IMG = (H // PATCH) * (W // PATCH)
NVIS_TOK = N_IMG * NVIS_PER_IMG       # vision tokens per sample
S_LM = NVIS_TOK + T_TXT               # fused LM sequence length per sample
VOCAB_TOTAL = VOCAB + NUM_SPECIAL     # 49
VOCAB_PAD = 128                       # lane-dense logits store, sliced in wrapper
EMB_ROWS = -(-VOCAB_TOTAL // 8) * 8   # embedding rows padded to sublane multiple

DTYPE = jnp.float32                   # activations / biases / LN params
WDT = jnp.bfloat16                    # matmul weight dtype (MXU-native)
SLAB_W = 128                          # slab lane width


# --------------------------- slab layouts ------------------------------------
def _build_wlayout():
    """bf16 matmul-weight slab: row-stacked, row offsets 8-aligned, 128 lanes."""
    offs, cur = {}, 0

    def add(name, rows, cols):
        nonlocal cur
        offs[name] = (cur, rows, cols)
        cur += -(-rows // 8) * 8

    add("patch_w", CPP, D_VIS)
    add("vis_wqkv", D_VIS, 3 * D_VIS)
    add("vis_wo", D_VIS, D_VIS)
    add("vis_wfc1", D_VIS, MLP_MULT * D_VIS)
    add("vis_wfc2", MLP_MULT * D_VIS, D_VIS)
    add("tok_w", D_VIS, D_LANG)
    add("emb", EMB_ROWS, D_LANG)
    add("lm_wqkv", D_LANG, 3 * D_LANG)
    add("lm_wo", D_LANG, D_LANG)
    add("lm_wfc1", D_LANG, MLP_MULT * D_LANG)
    add("lm_wfc2", MLP_MULT * D_LANG, D_LANG)
    add("head_w", D_LANG, VOCAB_PAD)
    return offs, cur


def _build_playout():
    """f32 LN/bias/pos-emb slab: one row per vector param, 128 lanes."""
    offs, cur = {}, 0

    def add(name, rows, cols):
        nonlocal cur
        offs[name] = (cur, rows, cols)
        cur += rows

    add("patch_b", 1, D_VIS)
    add("pos_emb", NVIS_PER_IMG, D_VIS)
    for pre, d in (("vis", D_VIS), ("lm", D_LANG)):
        add(f"{pre}_ln1_g", 1, d)
        add(f"{pre}_ln1_b", 1, d)
        add(f"{pre}_bqkv", 1, 3 * d)
        add(f"{pre}_bo", 1, d)
        add(f"{pre}_ln2_g", 1, d)
        add(f"{pre}_ln2_b", 1, d)
        add(f"{pre}_bfc1", 1, MLP_MULT * d)
        add(f"{pre}_bfc2", 1, d)
    add("tok_b", 1, D_LANG)
    add("lnf_g", 1, D_LANG)
    add("lnf_b", 1, D_LANG)
    add("head_b", 1, VOCAB_PAD)
    return offs, cur


W_OFFS, W_ROWS = _build_wlayout()
P_OFFS, _P_RAW = _build_playout()
P_ROWS = -(-_P_RAW // 8) * 8


# --------------------------- in-kernel helpers -------------------------------
def _wget(wref, name):
    r, n, c = W_OFFS[name]
    return wref[r:r + n, 0:c]                     # static, 8-aligned slab slice (bf16)


def _pget(pref, name):
    r, n, c = P_OFFS[name]
    return pref[r:r + n, 0:c]                     # (n, c) f32 row(s)


def _bdot(a_bf16, w_bf16):
    """bf16 x bf16 matmul with f32 accumulation (MXU-native)."""
    return jnp.dot(a_bf16, w_bf16, preferred_element_type=jnp.float32)


def _layer_norm(x, g, b):
    mu = jnp.mean(x, axis=-1, keepdims=True)
    xc = x - mu
    var = jnp.mean(xc * xc, axis=-1, keepdims=True)
    return xc * lax.rsqrt(var + 1e-5) * g + b


def _transformer_block(x, keep, n_heads, prefix, wref, pref):
    """Pre-LN transformer block on batch-stacked rows, fully in VMEM.

    x: (R, D) f32, keep: (R, R) bool (block-diagonal over batch, + causal/pad for LM).
    """
    R, D = x.shape
    dh = D // n_heads
    scale = 1.0 / math.sqrt(dh)

    # ---- attention (fused QKV, per-head static lane slices) ----
    h = _layer_norm(x, _pget(pref, prefix + "_ln1_g"), _pget(pref, prefix + "_ln1_b"))
    hb = h.astype(jnp.bfloat16)                                    # cast once per block
    qkv = _bdot(hb, _wget(wref, prefix + "_wqkv")) + _pget(pref, prefix + "_bqkv")  # (R, 3D)
    heads = []
    for hh in range(n_heads):                                      # unrolled, stays in vregs
        q = qkv[:, hh * dh:(hh + 1) * dh] * scale
        k = qkv[:, D + hh * dh:D + (hh + 1) * dh]
        v = qkv[:, 2 * D + hh * dh:2 * D + (hh + 1) * dh]
        # contract the Dh axis of both operands: no explicit XLU transpose of K
        s = lax.dot_general(q.astype(jnp.bfloat16), k.astype(jnp.bfloat16),
                            (((1,), (1,)), ((), ())),
                            preferred_element_type=jnp.float32)    # (R, R)
        s = jnp.where(keep, s, -1e30)
        s = s - jnp.max(s, axis=-1, keepdims=True)
        e = jnp.exp(s)
        p = e * pl.reciprocal(jnp.sum(e, axis=-1, keepdims=True), approx=True)
        heads.append(_bdot(p.astype(jnp.bfloat16), v.astype(jnp.bfloat16)))  # (R, Dh)
    o = jnp.concatenate(heads, axis=-1).astype(jnp.bfloat16)       # (R, D)
    attn = _bdot(o, _wget(wref, prefix + "_wo")) + _pget(pref, prefix + "_bo")
    x = x + attn

    # ---- MLP ----
    h = _layer_norm(x, _pget(pref, prefix + "_ln2_g"), _pget(pref, prefix + "_ln2_b"))
    hb = h.astype(jnp.bfloat16)
    h = jax.nn.gelu(_bdot(hb, _wget(wref, prefix + "_wfc1")) + _pget(pref, prefix + "_bfc1"))
    h = _bdot(h.astype(jnp.bfloat16), _wget(wref, prefix + "_wfc2")) + _pget(pref, prefix + "_bfc2")
    return x + h


# --------------------------- the fused kernel --------------------------------
def vlm_kernel(patches_ref, ids_ref, vis_keep_ref, lm_keep_ref,
               wslab_ref, pslab_ref, out_ref):
    # ---- 1. vision encoder: patch-embed conv (as matmul) + pos emb + block ----
    patches = patches_ref[...]                                          # (B*NVIS, CPP) f32
    x = _bdot(patches.astype(jnp.bfloat16), _wget(wslab_ref, "patch_w")) \
        + _pget(pslab_ref, "patch_b")                                   # (B*NVIS, D_VIS)
    pe = _pget(pslab_ref, "pos_emb")                                    # (NVIS_PER_IMG, D_VIS)
    n_rep = x.shape[0] // pe.shape[0]
    x = x + jnp.concatenate([pe] * n_rep, axis=0)                       # per-image pos emb
    vis_keep = vis_keep_ref[...] > 0                                    # block-diag per image
    x = _transformer_block(x, vis_keep, VIS_HEADS, "vis", wslab_ref, pslab_ref)

    # ---- 2. vision tokenizer: linear projection head to d_lang ----
    vis_tok = _bdot(x.astype(jnp.bfloat16), _wget(wslab_ref, "tok_w")) \
        + _pget(pslab_ref, "tok_b")                                     # (B*NVIS, D_LANG)

    # ---- 3a. DecoupledEmbedding lookup (in-kernel one-hot; never leaves vregs) ----
    ids = ids_ref[...]                                                  # (B*T_TXT, 1) int32
    iota = lax.broadcasted_iota(jnp.int32, (ids.shape[0], EMB_ROWS), 1)
    onehot = (ids == iota).astype(jnp.bfloat16)
    txt_emb = _bdot(onehot, _wget(wslab_ref, "emb"))                    # (B*T_TXT, D_LANG)

    # ---- 3b. fusion: direct placement of vision tokens in the LM sequence ----
    # Rows are stacked [all vision tokens ; all text tokens]; the per-sample
    # "vision tokens precede text" causal layout lives in lm_keep (built in wrapper).
    # TODO(synk): the reference VLMWithLanguageStream scatters vision tokens at each
    # <image> media-token position (data-dependent insertion); here the layout is a
    # fixed per-sample prepend, as in the previous version.
    hseq = jnp.concatenate([vis_tok, txt_emb], axis=0)                  # (B*S_LM, D_LANG)

    # ---- 4. language model: causal decoder block + final LN + head ----
    lm_keep = lm_keep_ref[...] > 0                                      # batch-block/causal/pad
    hseq = _transformer_block(hseq, lm_keep, LM_HEADS, "lm", wslab_ref, pslab_ref)
    hseq = _layer_norm(hseq, _pget(pslab_ref, "lnf_g"), _pget(pslab_ref, "lnf_b"))
    logits = _bdot(hseq.astype(jnp.bfloat16), _wget(wslab_ref, "head_w")) \
        + _pget(pslab_ref, "head_b")                                    # (B*S_LM, VOCAB_PAD)

    # lane-dense (128 lanes) / sublane-aligned (24 rows) unmasked store
    out_ref[...] = logits.astype(out_ref.dtype)
    # TODO(synk): labels -> cross-entropy loss and past_key_values/use_cache caching
    # paths of VLM.forward are not implemented.


# --------------------------- params -----------------------------------------
def init_params(key):
    """Builds the two packed parameter slabs (done ONCE, outside the forward)."""
    def nrm(k, shape, std=0.02):          # initializer_range = 0.02, as in the module
        return std * jax.random.normal(k, shape, dtype=jnp.float32)

    keys = iter(jax.random.split(key, 32))
    wslab = jnp.zeros((W_ROWS, SLAB_W), jnp.float32)
    pslab = jnp.zeros((P_ROWS, SLAB_W), jnp.float32)

    def put_w(name, val):
        nonlocal wslab
        r, _, _ = W_OFFS[name]
        wslab = wslab.at[r:r + val.shape[0], 0:val.shape[1]].set(val)

    def put_p(name, val):
        nonlocal pslab
        r, _, _ = P_OFFS[name]
        pslab = pslab.at[r:r + val.shape[0], 0:val.shape[1]].set(val)

    # vision encoder: patch-embed conv (kernel = stride = PATCH) as im2col matmul
    put_w("patch_w", nrm(next(keys), (CPP, D_VIS)))
    put_p("pos_emb", nrm(next(keys), (NVIS_PER_IMG, D_VIS)))
    for pre, d in (("vis", D_VIS), ("lm", D_LANG)):
        put_p(f"{pre}_ln1_g", jnp.ones((1, d)))
        put_p(f"{pre}_ln2_g", jnp.ones((1, d)))
        put_w(f"{pre}_wqkv", nrm(next(keys), (d, 3 * d)))      # torch (D, 3D) QKV weight
        put_w(f"{pre}_wo", nrm(next(keys), (d, d)))
        put_w(f"{pre}_wfc1", nrm(next(keys), (d, MLP_MULT * d)))
        put_w(f"{pre}_wfc2", nrm(next(keys), (MLP_MULT * d, d)))
    # vision tokenizer: linear projection head (dim_media = D_LANG)
    put_w("tok_w", nrm(next(keys), (D_VIS, D_LANG)))
    # DecoupledEmbedding: base table (padding_idx row zeroed) + additional embedding
    emb_base = nrm(next(keys), (VOCAB, D_LANG)).at[PAD_ID].set(0.0)
    emb_add = nrm(next(keys), (NUM_SPECIAL, D_LANG))
    put_w("emb", jnp.concatenate([emb_base, emb_add], axis=0))
    # final LN + DecoupledLinear head (base + additional_fc), vocab padded to 128 lanes
    put_p("lnf_g", jnp.ones((1, D_LANG)))
    head = jnp.zeros((D_LANG, VOCAB_PAD), jnp.float32)
    head = head.at[:, :VOCAB].set(nrm(next(keys), (D_LANG, VOCAB)))
    head = head.at[:, VOCAB:VOCAB_TOTAL].set(nrm(next(keys), (D_LANG, NUM_SPECIAL)))
    put_w("head_w", head)
    # (all zero-initialized biases / LN betas are already zero rows in the slab)

    return {"wslab": wslab.astype(WDT), "pslab": pslab.astype(DTYPE)}


# --------------------------- forward wrapper ---------------------------------
def vlm_forward(params, vision_x, lang_x, attention_mask):
    """VLM.forward(vision_x, lang_x, attention_mask) -> logits (B, S, vocab+special)."""
    Bb, T, Fr, Cc, Hh, Ww = vision_x.shape
    gh, gw = Hh // PATCH, Ww // PATCH
    nvpi = gh * gw
    n_img = Bb * T * Fr
    nvis_tok = T * Fr * nvpi
    t_txt = lang_x.shape[1]
    r_vis = n_img * nvpi
    r_txt = Bb * t_txt

    # im2col patch extraction (layout-only, matches torch Conv2d (C, ph, pw) flattening)
    patches = vision_x.reshape(n_img, Cc, gh, PATCH, gw, PATCH)
    patches = patches.transpose(0, 2, 4, 1, 3, 5).reshape(r_vis, Cc * PATCH * PATCH)

    ids = lang_x.astype(jnp.int32).reshape(r_txt, 1)

    # vision-encoder attention: block-diagonal over the (b T F) stacked images
    img_id = jnp.repeat(jnp.arange(n_img, dtype=jnp.int32), nvpi)
    vis_keep = (img_id[:, None] == img_id[None, :]).astype(jnp.int32)

    # LM attention: per-sample fused sequence [vision ; text], causal, key padding.
    batch_id = jnp.concatenate([jnp.repeat(jnp.arange(Bb, dtype=jnp.int32), nvis_tok),
                                jnp.repeat(jnp.arange(Bb, dtype=jnp.int32), t_txt)])
    pos = jnp.concatenate([jnp.tile(jnp.arange(nvis_tok, dtype=jnp.int32), Bb),
                           jnp.tile(jnp.arange(t_txt, dtype=jnp.int32) + nvis_tok, Bb)])
    key_valid = jnp.concatenate([jnp.ones((r_vis,), jnp.int32),
                                 attention_mask.astype(jnp.int32).reshape(-1)])
    lm_keep = ((batch_id[:, None] == batch_id[None, :])
               & (pos[None, :] <= pos[:, None])
               & (key_valid[None, :] > 0)).astype(jnp.int32)

    vmem = pl.BlockSpec(memory_space=pltpu.MemorySpace.VMEM)
    out = pl.pallas_call(
        vlm_kernel,
        in_specs=[vmem] * 6,
        out_specs=vmem,
        out_shape=jax.ShapeDtypeStruct((r_vis + r_txt, VOCAB_PAD), jnp.float32),
    )(patches, ids, vis_keep, lm_keep, params["wslab"], params["pslab"])

    # un-stack: rows [0, r_vis) are the per-sample vision-token positions,
    # rows [r_vis, ...) the text positions; reassemble (B, S_LM, vocab+special).
    vis_logits = out[:r_vis, :VOCAB_TOTAL].reshape(Bb, nvis_tok, VOCAB_TOTAL)
    txt_logits = out[r_vis:, :VOCAB_TOTAL].reshape(Bb, t_txt, VOCAB_TOTAL)
    return jnp.concatenate([vis_logits, txt_logits], axis=1)


# ------------------------------- main ---------------------------------------
if __name__ == "__main__":
    key = jax.random.PRNGKey(0)
    kp, kv, kt = jax.random.split(key, 3)
    params = init_params(kp)

    vision_x = jax.random.normal(kv, (B, T_IMG, FRAMES, C, H, W), dtype=DTYPE)
    lang_x = jax.random.randint(kt, (B, T_TXT), 1, VOCAB)
    lang_x = lang_x.at[:, 0].set(MEDIA_ID)            # "<image>" media token
    lang_x = lang_x.at[1, T_TXT - 1].set(PAD_ID)      # right padding on sample 1
    attention_mask = jnp.ones((B, T_TXT), jnp.int32).at[1, T_TXT - 1].set(0)

    logits = jax.jit(vlm_forward)(params, vision_x, lang_x, attention_mask)
    jax.block_until_ready(logits)

    assert logits.shape == (B, NVIS_TOK + T_TXT, VOCAB_TOTAL)
    assert bool(jnp.all(jnp.isfinite(logits)))
    print("KERNEL_OK")
</pallas_src>

<mosaic_0001>
module attributes {stable_mosaic.version = 11 : i64} {
  func.func @vlm_kernel(%arg0: memref<8x192xf32, #tpu.memory_space<vmem>>, %arg1: memref<16x1xi32, #tpu.memory_space<vmem>>, %arg2: memref<8x8xi32, #tpu.memory_space<vmem>>, %arg3: memref<24x24xi32, #tpu.memory_space<vmem>>, %arg4: memref<632x128xbf16, #tpu.memory_space<vmem>>, %arg5: memref<32x128xf32, #tpu.memory_space<vmem>>, %arg6: memref<24x128xf32, #tpu.memory_space<vmem>>) attributes {dimension_semantics = [], scalar_prefetch = 0 : i64, scratch_operands = 0 : i64, tpu.core_type = #tpu.core_type<tc>} {
    %c0 = arith.constant 0 : index
    %c0_0 = arith.constant 0 : index
    %0 = vector.load %arg0[%c0, %c0_0] : memref<8x192xf32, #tpu.memory_space<vmem>>, vector<8x192xf32>
    %1 = arith.truncf %0 : vector<8x192xf32> to vector<8x192xbf16>
    %c0_1 = arith.constant 0 : index
    %c0_2 = arith.constant 0 : index
    %2 = vector.load %arg4[%c0_1, %c0_2] : memref<632x128xbf16, #tpu.memory_space<vmem>>, vector<192x32xbf16>
    %cst = arith.constant dense<0.000000e+00> : vector<8x32xf32>
    %3 = tpu.matmul %1, %2, %cst {dimension_numbers = #tpu.dot_dimension_numbers<[1], [0], [0], [1], [0, 0, 1, 1], [], []>} : vector<8x192xbf16>, vector<192x32xbf16>, vector<8x32xf32> -> vector<8x32xf32>
    %c0_3 = arith.constant 0 : index
    %c0_4 = arith.constant 0 : index
    %4 = vector.load %arg5[%c0_3, %c0_4] : memref<32x128xf32, #tpu.memory_space<vmem>>, vector<1x32xf32>
    %5 = vector.broadcast %4 : vector<1x32xf32> to vector<8x32xf32>
    %6 = arith.addf %3, %5 : vector<8x32xf32>
    %c1 = arith.constant 1 : index
    %c0_5 = arith.constant 0 : index
    %7 = vector.load %arg5[%c1, %c0_5] : memref<32x128xf32, #tpu.memory_space<vmem>>, vector<4x32xf32>
    %8 = tpu.concatenate %7, %7 in 0 : vector<4x32xf32>, vector<4x32xf32> -> vector<8x32xf32>
    %9 = arith.addf %6, %8 : vector<8x32xf32>
    %c0_6 = arith.constant 0 : index
    %c0_7 = arith.constant 0 : index
    %10 = vector.load %arg2[%c0_6, %c0_7] : memref<8x8xi32, #tpu.memory_space<vmem>>, vector<8x8xi32>
    %c0_i32 = arith.constant 0 : i32
    %11 = vector.broadcast %c0_i32 : i32 to vector<8x8xi32>
    %12 = arith.cmpi sgt, %10, %11 : vector<8x8xi32>
    %c5 = arith.constant 5 : index
    %c0_8 = arith.constant 0 : index
    %13 = vector.load %arg5[%c5, %c0_8] : memref<32x128xf32, #tpu.memory_space<vmem>>, vector<1x32xf32>
    %c6 = arith.constant 6 : index
    %c0_9 = arith.constant 0 : index
    %14 = vector.load %arg5[%c6, %c0_9] : memref<32x128xf32, #tpu.memory_space<vmem>>, vector<1x32xf32>
    %cst_10 = arith.constant dense<0.000000e+00> : vector<8xf32>
    %15 = vector.multi_reduction <add>, %9, %cst_10 [1] : vector<8x32xf32> to vector<8xf32>
    %16 = vector.shape_cast %15 : vector<8xf32> to vector<8x1xf32>
    %cst_11 = arith.constant 3.200000e+01 : f32
    %17 = vector.broadcast %cst_11 : f32 to vector<8x1xf32>
    %18 = arith.divf %16, %17 : vector<8x1xf32>
    %19 = vector.broadcast %18 : vector<8x1xf32> to vector<8x32xf32>
    %20 = arith.subf %9, %19 : vector<8x32xf32>
    %21 = arith.mulf %20, %20 : vector<8x32xf32>
    %cst_12 = arith.constant dense<0.000000e+00> : vector<8xf32>
    %22 = vector.multi_reduction <add>, %21, %cst_12 [1] : vector<8x32xf32> to vector<8xf32>
    %23 = vector.shape_cast %22 : vector<8xf32> to vector<8x1xf32>
    %cst_13 = arith.constant 3.200000e+01 : f32
    %24 = vector.broadcast %cst_13 : f32 to vector<8x1xf32>
    %25 = arith.divf %23, %24 : vector<8x1xf32>
    %cst_14 = arith.constant 9.99999974E-6 : f32
    %26 = vector.broadcast %cst_14 : f32 to vector<8x1xf32>
    %27 = arith.addf %25, %26 : vector<8x1xf32>
    %28 = math.rsqrt %27 : vector<8x1xf32>
    %29 = vector.broadcast %28 : vector<8x1xf32> to vector<8x32xf32>
    %30 = arith.mulf %20, %29 : vector<8x32xf32>
    %31 = vector.broadcast %13 : vector<1x32xf32> to vector<8x32xf32>
    %32 = arith.mulf %30, %31 : vector<8x32xf32>
    %33 = vector.broadcast %14 : vector<1x32xf32> to vector<8x32xf32>
    %34 = arith.addf %32, %33 : vector<8x32xf32>
    %35 = arith.truncf %34 : vector<8x32xf32> to vector<8x32xbf16>
    %c192 = arith.constant 192 : index
    %c0_15 = arith.constant 0 : index
    %36 = vector.load %arg4[%c192, %c0_15] : memref<632x128xbf16, #tpu.memory_space<vmem>>, vector<32x96xbf16>
    %cst_16 = arith.constant dense<0.000000e+00> : vector<8x96xf32>
    %37 = tpu.matmul %35, %36, %cst_16 {dimension_numbers = #tpu.dot_dimension_numbers<[1], [0], [0], [1], [0, 0, 1, 1], [], []>} : vector<8x32xbf16>, vector<32x96xbf16>, vector<8x96xf32> -> vector<8x96xf32>
    %c7 = arith.constant 7 : index
    %c0_17 = arith.constant 0 : index
    %38 = vector.load %arg5[%c7, %c0_17] : memref<32x128xf32, #tpu.memory_space<vmem>>, vector<1x96xf32>
    %39 = vector.broadcast %38 : vector<1x96xf32> to vector<8x96xf32>
    %40 = arith.addf %37, %39 : vector<8x96xf32>
    %41 = vector.extract_strided_slice %40 {offsets = [0, 0], sizes = [8, 8], strides = [1, 1]} : vector<8x96xf32> to vector<8x8xf32>
    %cst_18 = arith.constant 0.353553385 : f32
    %42 = vector.broadcast %cst_18 : f32 to vector<8x8xf32>
    %43 = arith.mulf %41, %42 : vector<8x8xf32>
    %44 = vector.extract_strided_slice %40 {offsets = [0, 32], sizes = [8, 8], strides = [1, 1]} : vector<8x96xf32> to vector<8x8xf32>
    %45 = vector.extract_strided_slice %40 {offsets = [0, 64], sizes = [8, 8], strides = [1, 1]} : vector<8x96xf32> to vector<8x8xf32>
    %46 = arith.truncf %43 : vector<8x8xf32> to vector<8x8xbf16>
    %47 = arith.truncf %44 : vector<8x8xf32> to vector<8x8xbf16>
    %cst_19 = arith.constant dense<0.000000e+00> : vector<8x8xf32>
    %48 = tpu.matmul %46, %47, %cst_19 {dimension_numbers = #tpu.dot_dimension_numbers<[1], [1], [0], [0], [0, 0, 1, 0], [], []>} : vector<8x8xbf16>, vector<8x8xbf16>, vector<8x8xf32> -> vector<8x8xf32>
    %cst_20 = arith.constant -1.000000e+30 : f32
    %49 = vector.broadcast %cst_20 : f32 to vector<8x8xf32>
    %50 = arith.select %12, %48, %49 : vector<8x8xi1>, vector<8x8xf32>
    %cst_21 = arith.constant dense<0xFF800000> : vector<8xf32>
    %51 = vector.multi_reduction <maximumf>, %50, %cst_21 [1] : vector<8x8xf32> to vector<8xf32>
    %52 = vector.shape_cast %51 : vector<8xf32> to vector<8x1xf32>
    %53 = vector.broadcast %52 : vector<8x1xf32> to vector<8x8xf32>
    %54 = arith.subf %50, %53 : vector<8x8xf32>
    %55 = math.exp %54 : vector<8x8xf32>
    %cst_22 = arith.constant dense<0.000000e+00> : vector<8xf32>
    %56 = vector.multi_reduction <add>, %55, %cst_22 [1] : vector<8x8xf32> to vector<8xf32>
    %57 = vector.shape_cast %56 : vector<8xf32> to vector<8x1xf32>
    %58 = tpu.reciprocal %57 {approx = true} : vector<8x1xf32> -> vector<8x1xf32>
    %59 = vector.broadcast %58 : vector<8x1xf32> to vector<8x8xf32>
    %60 = arith.mulf %55, %59 : vector<8x8xf32>
    %61 = arith.truncf %60 : vector<8x8xf32> to vector<8x8xbf16>
    %62 = arith.truncf %45 : vector<8x8xf32> to vector<8x8xbf16>
    %cst_23 = arith.constant dense<0.000000e+00> : vector<8x8xf32>
    %63 = tpu.matmul %61, %62, %cst_23 {dimension_numbers = #tpu.dot_dimension_numbers<[1], [0], [0], [1], [0, 0, 1, 1], [], []>} : vector<8x8xbf16>, vector<8x8xbf16>, vector<8x8xf32> -> vector<8x8xf32>
    %64 = vector.extract_strided_slice %40 {offsets = [0, 8], sizes = [8, 8], strides = [1, 1]} : vector<8x96xf32> to vector<8x8xf32>
    %cst_24 = arith.constant 0.353553385 : f32
    %65 = vector.broadcast %cst_24 : f32 to vector<8x8xf32>
    %66 = arith.mulf %64, %65 : vector<8x8xf32>
    %67 = vector.extract_strided_slice %40 {offsets = [0, 40], sizes = [8, 8], strides = [1, 1]} : vector<8x96xf32> to vector<8x8xf32>
    %68 = vector.extract_strided_slice %40 {offsets = [0, 72], sizes = [8, 8], strides = [1, 1]} : vector<8x96xf32> to vector<8x8xf32>
    %69 = arith.truncf %66 : vector<8x8xf32> to vector<8x8xbf16>
    %70 = arith.truncf %67 : vector<8x8xf32> to vector<8x8xbf16>
    %cst_25 = arith.constant dense<0.000000e+00> : vector<8x8xf32>
    %71 = tpu.matmul %69, %70, %cst_25 {dimension_numbers = #tpu.dot_dimension_numbers<[1], [1], [0], [0], [0, 0, 1, 0], [], []>} : vector<8x8xbf16>, vector<8x8xbf16>, vector<8x8xf32> -> vector<8x8xf32>
    %cst_26 = arith.constant -1.000000e+30 : f32
    %72 = vector.broadcast %cst_26 : f32 to vector<8x8xf32>
    %73 = arith.select %12, %71, %72 : vector<8x8xi1>, vector<8x8xf32>
    %cst_27 = arith.constant dense<0xFF800000> : vector<8xf32>
    %74 = vector.multi_reduction <maximumf>, %73, %cst_27 [1] : vector<8x8xf32> to vector<8xf32>
    %75 = vector.shape_cast %74 : vector<8xf32> to vector<8x1xf32>
    %76 = vector.broadcast %75 : vector<8x1xf32> to vector<8x8xf32>
    %77 = arith.subf %73, %76 : vector<8x8xf32>
    %78 = math.exp %77 : vector<8x8xf32>
    %cst_28 = arith.constant dense<0.000000e+00> : vector<8xf32>
    %79 = vector.multi_reduction <add>, %78, %cst_28 [1] : vector<8x8xf32> to vector<8xf32>
    %80 = vector.shape_cast %79 : vector<8xf32> to vector<8x1xf32>
    %81 = tpu.reciprocal %80 {approx = true} : vector<8x1xf32> -> vector<8x1xf32>
    %82 = vector.broadcast %81 : vector<8x1xf32> to vector<8x8xf32>
    %83 = arith.mulf %78, %82 : vector<8x8xf32>
    %84 = arith.truncf %83 : vector<8x8xf32> to vector<8x8xbf16>
    %85 = arith.truncf %68 : vector<8x8xf32> to vector<8x8xbf16>
    %cst_29 = arith.constant dense<0.000000e+00> : vector<8x8xf32>
    %86 = tpu.matmul %84, %85, %cst_29 {dimension_numbers = #tpu.dot_dimension_numbers<[1], [0], [0], [1], [0, 0, 1, 1], [], []>} : vector<8x8xbf16>, vector<8x8xbf16>, vector<8x8xf32> -> vector<8x8xf32>
    %87 = vector.extract_strided_slice %40 {offsets = [0, 16], sizes = [8, 8], strides = [1, 1]} : vector<8x96xf32> to vector<8x8xf32>
    %cst_30 = arith.constant 0.353553385 : f32
    %88 = vector.broadcast %cst_30 : f32 to vector<8x8xf32>
    %89 = arith.mulf %87, %88 : vector<8x8xf32>
    %90 = vector.extract_strided_slice %40 {offsets = [0, 48], sizes = [8, 8], strides = [1, 1]} : vector<8x96xf32> to vector<8x8xf32>
    %91 = vector.extract_strided_slice %40 {offsets = [0, 80], sizes = [8, 8], strides = [1, 1]} : vector<8x96xf32> to vector<8x8xf32>
    %92 = arith.truncf %89 : vector<8x8xf32> to vector<8x8xbf16>
    %93 = arith.truncf %90 : vector<8x8xf32> to vector<8x8xbf16>
    %cst_31 = arith.constant dense<0.000000e+00> : vector<8x8xf32>
    %94 = tpu.matmul %92, %93, %cst_31 {dimension_numbers = #tpu.dot_dimension_numbers<[1], [1], [0], [0], [0, 0, 1, 0], [], []>} : vector<8x8xbf16>, vector<8x8xbf16>, vector<8x8xf32> -> vector<8x8xf32>
    %cst_32 = arith.constant -1.000000e+30 : f32
    %95 = vector.broadcast %cst_32 : f32 to vector<8x8xf32>
    %96 = arith.select %12, %94, %95 : vector<8x8xi1>, vector<8x8xf32>
    %cst_33 = arith.constant dense<0xFF800000> : vector<8xf32>
    %97 = vector.multi_reduction <maximumf>, %96, %cst_33 [1] : vector<8x8xf32> to vector<8xf32>
    %98 = vector.shape_cast %97 : vector<8xf32> to vector<8x1xf32>
    %99 = vector.broadcast %98 : vector<8x1xf32> to vector<8x8xf32>
    %100 = arith.subf %96, %99 : vector<8x8xf32>
    %101 = math.exp %100 : vector<8x8xf32>
    %cst_34 = arith.constant dense<0.000000e+00> : vector<8xf32>
    %102 = vector.multi_reduction <add>, %101, %cst_34 [1] : vector<8x8xf32> to vector<8xf32>
    %103 = vector.shape_cast %102 : vector<8xf32> to vector<8x1xf32>
    %104 = tpu.reciprocal %103 {approx = true} : vector<8x1xf32> -> vector<8x1xf32>
    %105 = vector.broadcast %104 : vector<8x1xf32> to vector<8x8xf32>
    %106 = arith.mulf %101, %105 : vector<8x8xf32>
    %107 = arith.truncf %106 : vector<8x8xf32> to vector<8x8xbf16>
    %108 = arith.truncf %91 : vector<8x8xf32> to vector<8x8xbf16>
    %cst_35 = arith.constant dense<0.000000e+00> : vector<8x8xf32>
    %109 = tpu.matmul %107, %108, %cst_35 {dimension_numbers = #tpu.dot_dimension_numbers<[1], [0], [0], [1], [0, 0, 1, 1], [], []>} : vector<8x8xbf16>, vector<8x8xbf16>, vector<8x8xf32> -> vector<8x8xf32>
    %110 = vector.extract_strided_slice %40 {offsets = [0, 24], sizes = [8, 8], strides = [1, 1]} : vector<8x96xf32> to vector<8x8xf32>
    %cst_36 = arith.constant 0.353553385 : f32
    %111 = vector.broadcast %cst_36 : f32 to vector<8x8xf32>
    %112 = arith.mulf %110, %111 : vector<8x8xf32>
    %113 = vector.extract_strided_slice %40 {offsets = [0, 56], sizes = [8, 8], strides = [1, 1]} : vector<8x96xf32> to vector<8x8xf32>
    %114 = vector.extract_strided_slice %40 {offsets = [0, 88], sizes = [8, 8], strides = [1, 1]} : vector<8x96xf32> to vector<8x8xf32>
    %115 = arith.truncf %112 : vector<8x8xf32> to vector<8x8xbf16>
    %116 = arith.truncf %113 : vector<8x8xf32> to vector<8x8xbf16>
    %cst_37 = arith.constant dense<0.000000e+00> : vector<8x8xf32>
    %117 = tpu.matmul %115, %116, %cst_37 {dimension_numbers = #tpu.dot_dimension_numbers<[1], [1], [0], [0], [0, 0, 1, 0], [], []>} : vector<8x8xbf16>, vector<8x8xbf16>, vector<8x8xf32> -> vector<8x8xf32>
    %cst_38 = arith.constant -1.000000e+30 : f32
    %118 = vector.broadcast %cst_38 : f32 to vector<8x8xf32>
    %119 = arith.select %12, %117, %118 : vector<8x8xi1>, vector<8x8xf32>
    %cst_39 = arith.constant dense<0xFF800000> : vector<8xf32>
    %120 = vector.multi_reduction <maximumf>, %119, %cst_39 [1] : vector<8x8xf32> to vector<8xf32>
    %121 = vector.shape_cast %120 : vector<8xf32> to vector<8x1xf32>
    %122 = vector.broadcast %121 : vector<8x1xf32> to vector<8x8xf32>
    %123 = arith.subf %119, %122 : vector<8x8xf32>
    %124 = math.exp %123 : vector<8x8xf32>
    %cst_40 = arith.constant dense<0.000000e+00> : vector<8xf32>
    %125 = vector.multi_reduction <add>, %124, %cst_40 [1] : vector<8x8xf32> to vector<8xf32>
    %126 = vector.shape_cast %125 : vector<8xf32> to vector<8x1xf32>
    %127 = tpu.reciprocal %126 {approx = true} : vector<8x1xf32> -> vector<8x1xf32>
    %128 = vector.broadcast %127 : vector<8x1xf32> to vector<8x8xf32>
    %129 = arith.mulf %124, %128 : vector<8x8xf32>
    %130 = arith.truncf %129 : vector<8x8xf32> to vector<8x8xbf16>
    %131 = arith.truncf %114 : vector<8x8xf32> to vector<8x8xbf16>
    %cst_41 = arith.constant dense<0.000000e+00> : vector<8x8xf32>
    %132 = tpu.matmul %130, %131, %cst_41 {dimension_numbers = #tpu.dot_dimension_numbers<[1], [0], [0], [1], [0, 0, 1, 1], [], []>} : vector<8x8xbf16>, vector<8x8xbf16>, vector<8x8xf32> -> vector<8x8xf32>
    %133 = tpu.concatenate %63, %86, %109, %132 in 1 : vector<8x8xf32>, vector<8x8xf32>, vector<8x8xf32>, vector<8x8xf32> -> vector<8x32xf32>
    %134 = arith.truncf %133 : vector<8x32xf32> to vector<8x32xbf16>
    %c224 = arith.constant 224 : index
    %c0_42 = arith.constant 0 : index
    %135 = vector.load %arg4[%c224, %c0_42] : memref<632x128xbf16, #tpu.memory_space<vmem>>, vector<32x32xbf16>
    %cst_43 = arith.constant dense<0.000000e+00> : vector<8x32xf32>
    %136 = tpu.matmul %134, %135, %cst_43 {dimension_numbers = #tpu.dot_dimension_numbers<[1], [0], [0], [1], [0, 0, 1, 1], [], []>} : vector<8x32xbf16>, vector<32x32xbf16>, vector<8x32xf32> -> vector<8x32xf32>
    %c8 = arith.constant 8 : index
    %c0_44 = arith.constant 0 : index
    %137 = vector.load %arg5[%c8, %c0_44] : memref<32x128xf32, #tpu.memory_space<vmem>>, vector<1x32xf32>
    %138 = vector.broadcast %137 : vector<1x32xf32> to vector<8x32xf32>
    %139 = arith.addf %136, %138 : vector<8x32xf32>
    %140 = arith.addf %9, %139 : vector<8x32xf32>
    %c9 = arith.constant 9 : index
    %c0_45 = arith.constant 0 : index
    %141 = vector.load %arg5[%c9, %c0_45] : memref<32x128xf32, #tpu.memory_space<vmem>>, vector<1x32xf32>
    %c10 = arith.constant 10 : index
    %c0_46 = arith.constant 0 : index
    %142 = vector.load %arg5[%c10, %c0_46] : memref<32x128xf32, #tpu.memory_space<vmem>>, vector<1x32xf32>
    %cst_47 = arith.constant dense<0.000000e+00> : vector<8xf32>
    %143 = vector.multi_reduction <add>, %140, %cst_47 [1] : vector<8x32xf32> to vector<8xf32>
    %144 = vector.shape_cast %143 : vector<8xf32> to vector<8x1xf32>
    %cst_48 = arith.constant 3.200000e+01 : f32
    %145 = vector.broadcast %cst_48 : f32 to vector<8x1xf32>
    %146 = arith.divf %144, %145 : vector<8x1xf32>
    %147 = vector.broadcast %146 : vector<8x1xf32> to vector<8x32xf32>
    %148 = arith.subf %140, %147 : vector<8x32xf32>
    %149 = arith.mulf %148, %148 : vector<8x32xf32>
    %cst_49 = arith.constant dense<0.000000e+00> : vector<8xf32>
    %150 = vector.multi_reduction <add>, %149, %cst_49 [1] : vector<8x32xf32> to vector<8xf32>
    %151 = vector.shape_cast %150 : vector<8xf32> to vector<8x1xf32>
    %cst_50 = arith.constant 3.200000e+01 : f32
    %152 = vector.broadcast %cst_50 : f32 to vector<8x1xf32>
    %153 = arith.divf %151, %152 : vector<8x1xf32>
    %cst_51 = arith.constant 9.99999974E-6 : f32
    %154 = vector.broadcast %cst_51 : f32 to vector<8x1xf32>
    %155 = arith.addf %153, %154 : vector<8x1xf32>
    %156 = math.rsqrt %155 : vector<8x1xf32>
    %157 = vector.broadcast %156 : vector<8x1xf32> to vector<8x32xf32>
    %158 = arith.mulf %148, %157 : vector<8x32xf32>
    %159 = vector.broadcast %141 : vector<1x32xf32> to vector<8x32xf32>
    %160 = arith.mulf %158, %159 : vector<8x32xf32>
    %161 = vector.broadcast %142 : vector<1x32xf32> to vector<8x32xf32>
    %162 = arith.addf %160, %161 : vector<8x32xf32>
    %163 = arith.truncf %162 : vector<8x32xf32> to vector<8x32xbf16>
    %c256 = arith.constant 256 : index
    %c0_52 = arith.constant 0 : index
    %164 = vector.load %arg4[%c256, %c0_52] : memref<632x128xbf16, #tpu.memory_space<vmem>>, vector<32x64xbf16>
    %cst_53 = arith.constant dense<0.000000e+00> : vector<8x64xf32>
    %165 = tpu.matmul %163, %164, %cst_53 {dimension_numbers = #tpu.dot_dimension_numbers<[1], [0], [0], [1], [0, 0, 1, 1], [], []>} : vector<8x32xbf16>, vector<32x64xbf16>, vector<8x64xf32> -> vector<8x64xf32>
    %c11 = arith.constant 11 : index
    %c0_54 = arith.constant 0 : index
    %166 = vector.load %arg5[%c11, %c0_54] : memref<32x128xf32, #tpu.memory_space<vmem>>, vector<1x64xf32>
    %167 = vector.broadcast %166 : vector<1x64xf32> to vector<8x64xf32>
    %168 = arith.addf %165, %167 : vector<8x64xf32>
    %169 = arith.mulf %168, %168 : vector<8x64xf32>
    %170 = arith.mulf %168, %169 : vector<8x64xf32>
    %cst_55 = arith.constant 4.471500e-02 : f32
    %171 = vector.broadcast %cst_55 : f32 to vector<8x64xf32>
    %172 = arith.mulf %171, %170 : vector<8x64xf32>
    %173 = arith.addf %168, %172 : vector<8x64xf32>
    %cst_56 = arith.constant 0.797884583 : f32
    %174 = vector.broadcast %cst_56 : f32 to vector<8x64xf32>
    %175 = arith.mulf %174, %173 : vector<8x64xf32>
    %176 = math.tanh %175 : vector<8x64xf32>
    %cst_57 = arith.constant 1.000000e+00 : f32
    %177 = vector.broadcast %cst_57 : f32 to vector<8x64xf32>
    %178 = arith.addf %177, %176 : vector<8x64xf32>
    %cst_58 = arith.constant 5.000000e-01 : f32
    %179 = vector.broadcast %cst_58 : f32 to vector<8x64xf32>
    %180 = arith.mulf %179, %178 : vector<8x64xf32>
    %181 = arith.mulf %168, %180 : vector<8x64xf32>
    %182 = arith.truncf %181 : vector<8x64xf32> to vector<8x64xbf16>
    %c288 = arith.constant 288 : index
    %c0_59 = arith.constant 0 : index
    %183 = vector.load %arg4[%c288, %c0_59] : memref<632x128xbf16, #tpu.memory_space<vmem>>, vector<64x32xbf16>
    %cst_60 = arith.constant dense<0.000000e+00> : vector<8x32xf32>
    %184 = tpu.matmul %182, %183, %cst_60 {dimension_numbers = #tpu.dot_dimension_numbers<[1], [0], [0], [1], [0, 0, 1, 1], [], []>} : vector<8x64xbf16>, vector<64x32xbf16>, vector<8x32xf32> -> vector<8x32xf32>
    %c12 = arith.constant 12 : index
    %c0_61 = arith.constant 0 : index
    %185 = vector.load %arg5[%c12, %c0_61] : memref<32x128xf32, #tpu.memory_space<vmem>>, vector<1x32xf32>
    %186 = vector.broadcast %185 : vector<1x32xf32> to vector<8x32xf32>
    %187 = arith.addf %184, %186 : vector<8x32xf32>
    %188 = arith.addf %140, %187 : vector<8x32xf32>
    %189 = arith.truncf %188 : vector<8x32xf32> to vector<8x32xbf16>
    %c352 = arith.constant 352 : index
    %c0_62 = arith.constant 0 : index
    %190 = vector.load %arg4[%c352, %c0_62] : memref<632x128xbf16, #tpu.memory_space<vmem>>, vector<32x32xbf16>
    %cst_63 = arith.constant dense<0.000000e+00> : vector<8x32xf32>
    %191 = tpu.matmul %189, %190, %cst_63 {dimension_numbers = #tpu.dot_dimension_numbers<[1], [0], [0], [1], [0, 0, 1, 1], [], []>} : vector<8x32xbf16>, vector<32x32xbf16>, vector<8x32xf32> -> vector<8x32xf32>
    %c21 = arith.constant 21 : index
    %c0_64 = arith.constant 0 : index
    %192 = vector.load %arg5[%c21, %c0_64] : memref<32x128xf32, #tpu.memory_space<vmem>>, vector<1x32xf32>
    %193 = vector.broadcast %192 : vector<1x32xf32> to vector<8x32xf32>
    %194 = arith.addf %191, %193 : vector<8x32xf32>
    %c0_65 = arith.constant 0 : index
    %c0_66 = arith.constant 0 : index
    %195 = vector.load %arg1[%c0_65, %c0_66] : memref<16x1xi32, #tpu.memory_space<vmem>>, vector<16x1xi32>
    %196 = tpu.iota {dimensions = array<i32: 1>} : vector<16x56xi32>
    %197 = vector.broadcast %195 : vector<16x1xi32> to vector<16x56xi32>
    %198 = arith.cmpi eq, %197, %196 : vector<16x56xi32>
    %199 = arith.extui %198 : vector<16x56xi1> to vector<16x56xi32>
    %200 = arith.sitofp %199 : vector<16x56xi32> to vector<16x56xf32>
    %201 = arith.truncf %200 : vector<16x56xf32> to vector<16x56xbf16>
    %c384 = arith.constant 384 : index
    %c0_67 = arith.constant 0 : index
    %202 = vector.load %arg4[%c384, %c0_67] : memref<632x128xbf16, #tpu.memory_space<vmem>>, vector<56x32xbf16>
    %cst_68 = arith.constant dense<0.000000e+00> : vector<16x32xf32>
    %203 = tpu.matmul %201, %202, %cst_68 {dimension_numbers = #tpu.dot_dimension_numbers<[1], [0], [0], [1], [0, 0, 1, 1], [], []>} : vector<16x56xbf16>, vector<56x32xbf16>, vector<16x32xf32> -> vector<16x32xf32>
    %204 = tpu.concatenate %194, %203 in 0 : vector<8x32xf32>, vector<16x32xf32> -> vector<24x32xf32>
    %c0_69 = arith.constant 0 : index
    %c0_70 = arith.constant 0 : index
    %205 = vector.load %arg3[%c0_69, %c0_70] : memref<24x24xi32, #tpu.memory_space<vmem>>, vector<24x24xi32>
    %c0_i32_71 = arith.constant 0 : i32
    %206 = vector.broadcast %c0_i32_71 : i32 to vector<24x24xi32>
    %207 = arith.cmpi sgt, %205, %206 : vector<24x24xi32>
    %c13 = arith.constant 13 : index
    %c0_72 = arith.constant 0 : index
    %208 = vector.load %arg5[%c13, %c0_72] : memref<32x128xf32, #tpu.memory_space<vmem>>, vector<1x32xf32>
    %c14 = arith.constant 14 : index
    %c0_73 = arith.constant 0 : index
    %209 = vector.load %arg5[%c14, %c0_73] : memref<32x128xf32, #tpu.memory_space<vmem>>, vector<1x32xf32>
    %cst_74 = arith.constant dense<0.000000e+00> : vector<24xf32>
    %210 = vector.multi_reduction <add>, %204, %cst_74 [1] : vector<24x32xf32> to vector<24xf32>
    %211 = vector.shape_cast %210 : vector<24xf32> to vector<24x1xf32>
    %cst_75 = arith.constant 3.200000e+01 : f32
    %212 = vector.broadcast %cst_75 : f32 to vector<24x1xf32>
    %213 = arith.divf %211, %212 : vector<24x1xf32>
    %214 = vector.broadcast %213 : vector<24x1xf32> to vector<24x32xf32>
    %215 = arith.subf %204, %214 : vector<24x32xf32>
    %216 = arith.mulf %215, %215 : vector<24x32xf32>
    %cst_76 = arith.constant dense<0.000000e+00> : vector<24xf32>
    %217 = vector.multi_reduction <add>, %216, %cst_76 [1] : vector<24x32xf32> to vector<24xf32>
    %218 = vector.shape_cast %217 : vector<24xf32> to vector<24x1xf32>
    %cst_77 = arith.constant 3.200000e+01 : f32
    %219 = vector.broadcast %cst_77 : f32 to vector<24x1xf32>
    %220 = arith.divf %218, %219 : vector<24x1xf32>
    %cst_78 = arith.constant 9.99999974E-6 : f32
    %221 = vector.broadcast %cst_78 : f32 to vector<24x1xf32>
    %222 = arith.addf %220, %221 : vector<24x1xf32>
    %223 = math.rsqrt %222 : vector<24x1xf32>
    %224 = vector.broadcast %223 : vector<24x1xf32> to vector<24x32xf32>
    %225 = arith.mulf %215, %224 : vector<24x32xf32>
    %226 = vector.broadcast %208 : vector<1x32xf32> to vector<24x32xf32>
    %227 = arith.mulf %225, %226 : vector<24x32xf32>
    %228 = vector.broadcast %209 : vector<1x32xf32> to vector<24x32xf32>
    %229 = arith.addf %227, %228 : vector<24x32xf32>
    %230 = arith.truncf %229 : vector<24x32xf32> to vector<24x32xbf16>
    %c440 = arith.constant 440 : index
    %c0_79 = arith.constant 0 : index
    %231 = vector.load %arg4[%c440, %c0_79] : memref<632x128xbf16, #tpu.memory_space<vmem>>, vector<32x96xbf16>
    %cst_80 = arith.constant dense<0.000000e+00> : vector<24x96xf32>
    %232 = tpu.matmul %230, %231, %cst_80 {dimension_numbers = #tpu.dot_dimension_numbers<[1], [0], [0], [1], [0, 0, 1, 1], [], []>} : vector<24x32xbf16>, vector<32x96xbf16>, vector<24x96xf32> -> vector<24x96xf32>
    %c15 = arith.constant 15 : index
    %c0_81 = arith.constant 0 : index
    %233 = vector.load %arg5[%c15, %c0_81] : memref<32x128xf32, #tpu.memory_space<vmem>>, vector<1x96xf32>
    %234 = vector.broadcast %233 : vector<1x96xf32> to vector<24x96xf32>
    %235 = arith.addf %232, %234 : vector<24x96xf32>
    %236 = vector.extract_strided_slice %235 {offsets = [0, 0], sizes = [24, 8], strides = [1, 1]} : vector<24x96xf32> to vector<24x8xf32>
    %cst_82 = arith.constant 0.353553385 : f32
    %237 = vector.broadcast %cst_82 : f32 to vector<24x8xf32>
    %238 = arith.mulf %236, %237 : vector<24x8xf32>
    %239 = vector.extract_strided_slice %235 {offsets = [0, 32], sizes = [24, 8], strides = [1, 1]} : vector<24x96xf32> to vector<24x8xf32>
    %240 = vector.extract_strided_slice %235 {offsets = [0, 64], sizes = [24, 8], strides = [1, 1]} : vector<24x96xf32> to vector<24x8xf32>
    %241 = arith.truncf %238 : vector<24x8xf32> to vector<24x8xbf16>
    %242 = arith.truncf %239 : vector<24x8xf32> to vector<24x8xbf16>
    %cst_83 = arith.constant dense<0.000000e+00> : vector<24x24xf32>
    %243 = tpu.matmul %241, %242, %cst_83 {dimension_numbers = #tpu.dot_dimension_numbers<[1], [1], [0], [0], [0, 0, 1, 0], [], []>} : vector<24x8xbf16>, vector<24x8xbf16>, vector<24x24xf32> -> vector<24x24xf32>
    %cst_84 = arith.constant -1.000000e+30 : f32
    %244 = vector.broadcast %cst_84 : f32 to vector<24x24xf32>
    %245 = arith.select %207, %243, %244 : vector<24x24xi1>, vector<24x24xf32>
    %cst_85 = arith.constant dense<0xFF800000> : vector<24xf32>
    %246 = vector.multi_reduction <maximumf>, %245, %cst_85 [1] : vector<24x24xf32> to vector<24xf32>
    %247 = vector.shape_cast %246 : vector<24xf32> to vector<24x1xf32>
    %248 = vector.broadcast %247 : vector<24x1xf32> to vector<24x24xf32>
    %249 = arith.subf %245, %248 : vector<24x24xf32>
    %250 = math.exp %249 : vector<24x24xf32>
    %cst_86 = arith.constant dense<0.000000e+00> : vector<24xf32>
    %251 = vector.multi_reduction <add>, %250, %cst_86 [1] : vector<24x24xf32> to vector<24xf32>
    %252 = vector.shape_cast %251 : vector<24xf32> to vector<24x1xf32>
    %253 = tpu.reciprocal %252 {approx = true} : vector<24x1xf32> -> vector<24x1xf32>
    %254 = vector.broadcast %253 : vector<24x1xf32> to vector<24x24xf32>
    %255 = arith.mulf %250, %254 : vector<24x24xf32>
    %256 = arith.truncf %255 : vector<24x24xf32> to vector<24x24xbf16>
    %257 = arith.truncf %240 : vector<24x8xf32> to vector<24x8xbf16>
    %cst_87 = arith.constant dense<0.000000e+00> : vector<24x8xf32>
    %258 = tpu.matmul %256, %257, %cst_87 {dimension_numbers = #tpu.dot_dimension_numbers<[1], [0], [0], [1], [0, 0, 1, 1], [], []>} : vector<24x24xbf16>, vector<24x8xbf16>, vector<24x8xf32> -> vector<24x8xf32>
    %259 = vector.extract_strided_slice %235 {offsets = [0, 8], sizes = [24, 8], strides = [1, 1]} : vector<24x96xf32> to vector<24x8xf32>
    %cst_88 = arith.constant 0.353553385 : f32
    %260 = vector.broadcast %cst_88 : f32 to vector<24x8xf32>
    %261 = arith.mulf %259, %260 : vector<24x8xf32>
    %262 = vector.extract_strided_slice %235 {offsets = [0, 40], sizes = [24, 8], strides = [1, 1]} : vector<24x96xf32> to vector<24x8xf32>
    %263 = vector.extract_strided_slice %235 {offsets = [0, 72], sizes = [24, 8], strides = [1, 1]} : vector<24x96xf32> to vector<24x8xf32>
    %264 = arith.truncf %261 : vector<24x8xf32> to vector<24x8xbf16>
    %265 = arith.truncf %262 : vector<24x8xf32> to vector<24x8xbf16>
    %cst_89 = arith.constant dense<0.000000e+00> : vector<24x24xf32>
    %266 = tpu.matmul %264, %265, %cst_89 {dimension_numbers = #tpu.dot_dimension_numbers<[1], [1], [0], [0], [0, 0, 1, 0], [], []>} : vector<24x8xbf16>, vector<24x8xbf16>, vector<24x24xf32> -> vector<24x24xf32>
    %cst_90 = arith.constant -1.000000e+30 : f32
    %267 = vector.broadcast %cst_90 : f32 to vector<24x24xf32>
    %268 = arith.select %207, %266, %267 : vector<24x24xi1>, vector<24x24xf32>
    %cst_91 = arith.constant dense<0xFF800000> : vector<24xf32>
    %269 = vector.multi_reduction <maximumf>, %268, %cst_91 [1] : vector<24x24xf32> to vector<24xf32>
    %270 = vector.shape_cast %269 : vector<24xf32> to vector<24x1xf32>
    %271 = vector.broadcast %270 : vector<24x1xf32> to vector<24x24xf32>
    %272 = arith.subf %268, %271 : vector<24x24xf32>
    %273 = math.exp %272 : vector<24x24xf32>
    %cst_92 = arith.constant dense<0.000000e+00> : vector<24xf32>
    %274 = vector.multi_reduction <add>, %273, %cst_92 [1] : vector<24x24xf32> to vector<24xf32>
    %275 = vector.shape_cast %274 : vector<24xf32> to vector<24x1xf32>
    %276 = tpu.reciprocal %275 {approx = true} : vector<24x1xf32> -> vector<24x1xf32>
    %277 = vector.broadcast %276 : vector<24x1xf32> to vector<24x24xf32>
    %278 = arith.mulf %273, %277 : vector<24x24xf32>
    %279 = arith.truncf %278 : vector<24x24xf32> to vector<24x24xbf16>
    %280 = arith.truncf %263 : vector<24x8xf32> to vector<24x8xbf16>
    %cst_93 = arith.constant dense<0.000000e+00> : vector<24x8xf32>
    %281 = tpu.matmul %279, %280, %cst_93 {dimension_numbers = #tpu.dot_dimension_numbers<[1], [0], [0], [1], [0, 0, 1, 1], [], []>} : vector<24x24xbf16>, vector<24x8xbf16>, vector<24x8xf32> -> vector<24x8xf32>
    %282 = vector.extract_strided_slice %235 {offsets = [0, 16], sizes = [24, 8], strides = [1, 1]} : vector<24x96xf32> to vector<24x8xf32>
    %cst_94 = arith.constant 0.353553385 : f32
    %283 = vector.broadcast %cst_94 : f32 to vector<24x8xf32>
    %284 = arith.mulf %282, %283 : vector<24x8xf32>
    %285 = vector.extract_strided_slice %235 {offsets = [0, 48], sizes = [24, 8], strides = [1, 1]} : vector<24x96xf32> to vector<24x8xf32>
    %286 = vector.extract_strided_slice %235 {offsets = [0, 80], sizes = [24, 8], strides = [1, 1]} : vector<24x96xf32> to vector<24x8xf32>
    %287 = arith.truncf %284 : vector<24x8xf32> to vector<24x8xbf16>
    %288 = arith.truncf %285 : vector<24x8xf32> to vector<24x8xbf16>
    %cst_95 = arith.constant dense<0.000000e+00> : vector<24x24xf32>
    %289 = tpu.matmul %287, %288, %cst_95 {dimension_numbers = #tpu.dot_dimension_numbers<[1], [1], [0], [0], [0, 0, 1, 0], [], []>} : vector<24x8xbf16>, vector<24x8xbf16>, vector<24x24xf32> -> vector<24x24xf32>
    %cst_96 = arith.constant -1.000000e+30 : f32
    %290 = vector.broadcast %cst_96 : f32 to vector<24x24xf32>
    %291 = arith.select %207, %289, %290 : vector<24x24xi1>, vector<24x24xf32>
    %cst_97 = arith.constant dense<0xFF800000> : vector<24xf32>
    %292 = vector.multi_reduction <maximumf>, %291, %cst_97 [1] : vector<24x24xf32> to vector<24xf32>
    %293 = vector.shape_cast %292 : vector<24xf32> to vector<24x1xf32>
    %294 = vector.broadcast %293 : vector<24x1xf32> to vector<24x24xf32>
    %295 = arith.subf %291, %294 : vector<24x24xf32>
    %296 = math.exp %295 : vector<24x24xf32>
    %cst_98 = arith.constant dense<0.000000e+00> : vector<24xf32>
    %297 = vector.multi_reduction <add>, %296, %cst_98 [1] : vector<24x24xf32> to vector<24xf32>
    %298 = vector.shape_cast %297 : vector<24xf32> to vector<24x1xf32>
    %299 = tpu.reciprocal %298 {approx = true} : vector<24x1xf32> -> vector<24x1xf32>
    %300 = vector.broadcast %299 : vector<24x1xf32> to vector<24x24xf32>
    %301 = arith.mulf %296, %300 : vector<24x24xf32>
    %302 = arith.truncf %301 : vector<24x24xf32> to vector<24x24xbf16>
    %303 = arith.truncf %286 : vector<24x8xf32> to vector<24x8xbf16>
    %cst_99 = arith.constant dense<0.000000e+00> : vector<24x8xf32>
    %304 = tpu.matmul %302, %303, %cst_99 {dimension_numbers = #tpu.dot_dimension_numbers<[1], [0], [0], [1], [0, 0, 1, 1], [], []>} : vector<24x24xbf16>, vector<24x8xbf16>, vector<24x8xf32> -> vector<24x8xf32>
    %305 = vector.extract_strided_slice %235 {offsets = [0, 24], sizes = [24, 8], strides = [1, 1]} : vector<24x96xf32> to vector<24x8xf32>
    %cst_100 = arith.constant 0.353553385 : f32
    %306 = vector.broadcast %cst_100 : f32 to vector<24x8xf32>
    %307 = arith.mulf %305, %306 : vector<24x8xf32>
    %308 = vector.extract_strided_slice %235 {offsets = [0, 56], sizes = [24, 8], strides = [1, 1]} : vector<24x96xf32> to vector<24x8xf32>
    %309 = vector.extract_strided_slice %235 {offsets = [0, 88], sizes = [24, 8], strides = [1, 1]} : vector<24x96xf32> to vector<24x8xf32>
    %310 = arith.truncf %307 : vector<24x8xf32> to vector<24x8xbf16>
    %311 = arith.truncf %308 : vector<24x8xf32> to vector<24x8xbf16>
    %cst_101 = arith.constant dense<0.000000e+00> : vector<24x24xf32>
    %312 = tpu.matmul %310, %311, %cst_101 {dimension_numbers = #tpu.dot_dimension_numbers<[1], [1], [0], [0], [0, 0, 1, 0], [], []>} : vector<24x8xbf16>, vector<24x8xbf16>, vector<24x24xf32> -> vector<24x24xf32>
    %cst_102 = arith.constant -1.000000e+30 : f32
    %313 = vector.broadcast %cst_102 : f32 to vector<24x24xf32>
    %314 = arith.select %207, %312, %313 : vector<24x24xi1>, vector<24x24xf32>
    %cst_103 = arith.constant dense<0xFF800000> : vector<24xf32>
    %315 = vector.multi_reduction <maximumf>, %314, %cst_103 [1] : vector<24x24xf32> to vector<24xf32>
    %316 = vector.shape_cast %315 : vector<24xf32> to vector<24x1xf32>
    %317 = vector.broadcast %316 : vector<24x1xf32> to vector<24x24xf32>
    %318 = arith.subf %314, %317 : vector<24x24xf32>
    %319 = math.exp %318 : vector<24x24xf32>
    %cst_104 = arith.constant dense<0.000000e+00> : vector<24xf32>
    %320 = vector.multi_reduction <add>, %319, %cst_104 [1] : vector<24x24xf32> to vector<24xf32>
    %321 = vector.shape_cast %320 : vector<24xf32> to vector<24x1xf32>
    %322 = tpu.reciprocal %321 {approx = true} : vector<24x1xf32> -> vector<24x1xf32>
    %323 = vector.broadcast %322 : vector<24x1xf32> to vector<24x24xf32>
    %324 = arith.mulf %319, %323 : vector<24x24xf32>
    %325 = arith.truncf %324 : vector<24x24xf32> to vector<24x24xbf16>
    %326 = arith.truncf %309 : vector<24x8xf32> to vector<24x8xbf16>
    %cst_105 = arith.constant dense<0.000000e+00> : vector<24x8xf32>
    %327 = tpu.matmul %325, %326, %cst_105 {dimension_numbers = #tpu.dot_dimension_numbers<[1], [0], [0], [1], [0, 0, 1, 1], [], []>} : vector<24x24xbf16>, vector<24x8xbf16>, vector<24x8xf32> -> vector<24x8xf32>
    %328 = tpu.concatenate %258, %281, %304, %327 in 1 : vector<24x8xf32>, vector<24x8xf32>, vector<24x8xf32>, vector<24x8xf32> -> vector<24x32xf32>
    %329 = arith.truncf %328 : vector<24x32xf32> to vector<24x32xbf16>
    %c472 = arith.constant 472 : index
    %c0_106 = arith.constant 0 : index
    %330 = vector.load %arg4[%c472, %c0_106] : memref<632x128xbf16, #tpu.memory_space<vmem>>, vector<32x32xbf16>
    %cst_107 = arith.constant dense<0.000000e+00> : vector<24x32xf32>
    %331 = tpu.matmul %329, %330, %cst_107 {dimension_numbers = #tpu.dot_dimension_numbers<[1], [0], [0], [1], [0, 0, 1, 1], [], []>} : vector<24x32xbf16>, vector<32x32xbf16>, vector<24x32xf32> -> vector<24x32xf32>
    %c16 = arith.constant 16 : index
    %c0_108 = arith.constant 0 : index
    %332 = vector.load %arg5[%c16, %c0_108] : memref<32x128xf32, #tpu.memory_space<vmem>>, vector<1x32xf32>
    %333 = vector.broadcast %332 : vector<1x32xf32> to vector<24x32xf32>
    %334 = arith.addf %331, %333 : vector<24x32xf32>
    %335 = arith.addf %204, %334 : vector<24x32xf32>
    %c17 = arith.constant 17 : index
    %c0_109 = arith.constant 0 : index
    %336 = vector.load %arg5[%c17, %c0_109] : memref<32x128xf32, #tpu.memory_space<vmem>>, vector<1x32xf32>
    %c18 = arith.constant 18 : index
    %c0_110 = arith.constant 0 : index
    %337 = vector.load %arg5[%c18, %c0_110] : memref<32x128xf32, #tpu.memory_space<vmem>>, vector<1x32xf32>
    %cst_111 = arith.constant dense<0.000000e+00> : vector<24xf32>
    %338 = vector.multi_reduction <add>, %335, %cst_111 [1] : vector<24x32xf32> to vector<24xf32>
    %339 = vector.shape_cast %338 : vector<24xf32> to vector<24x1xf32>
    %cst_112 = arith.constant 3.200000e+01 : f32
    %340 = vector.broadcast %cst_112 : f32 to vector<24x1xf32>
    %341 = arith.divf %339, %340 : vector<24x1xf32>
    %342 = vector.broadcast %341 : vector<24x1xf32> to vector<24x32xf32>
    %343 = arith.subf %335, %342 : vector<24x32xf32>
    %344 = arith.mulf %343, %343 : vector<24x32xf32>
    %cst_113 = arith.constant dense<0.000000e+00> : vector<24xf32>
    %345 = vector.multi_reduction <add>, %344, %cst_113 [1] : vector<24x32xf32> to vector<24xf32>
    %346 = vector.shape_cast %345 : vector<24xf32> to vector<24x1xf32>
    %cst_114 = arith.constant 3.200000e+01 : f32
    %347 = vector.broadcast %cst_114 : f32 to vector<24x1xf32>
    %348 = arith.divf %346, %347 : vector<24x1xf32>
    %cst_115 = arith.constant 9.99999974E-6 : f32
    %349 = vector.broadcast %cst_115 : f32 to vector<24x1xf32>
    %350 = arith.addf %348, %349 : vector<24x1xf32>
    %351 = math.rsqrt %350 : vector<24x1xf32>
    %352 = vector.broadcast %351 : vector<24x1xf32> to vector<24x32xf32>
    %353 = arith.mulf %343, %352 : vector<24x32xf32>
    %354 = vector.broadcast %336 : vector<1x32xf32> to vector<24x32xf32>
    %355 = arith.mulf %353, %354 : vector<24x32xf32>
    %356 = vector.broadcast %337 : vector<1x32xf32> to vector<24x32xf32>
    %357 = arith.addf %355, %356 : vector<24x32xf32>
    %358 = arith.truncf %357 : vector<24x32xf32> to vector<24x32xbf16>
    %c504 = arith.constant 504 : index
    %c0_116 = arith.constant 0 : index
    %359 = vector.load %arg4[%c504, %c0_116] : memref<632x128xbf16, #tpu.memory_space<vmem>>, vector<32x64xbf16>
    %cst_117 = arith.constant dense<0.000000e+00> : vector<24x64xf32>
    %360 = tpu.matmul %358, %359, %cst_117 {dimension_numbers = #tpu.dot_dimension_numbers<[1], [0], [0], [1], [0, 0, 1, 1], [], []>} : vector<24x32xbf16>, vector<32x64xbf16>, vector<24x64xf32> -> vector<24x64xf32>
    %c19 = arith.constant 19 : index
    %c0_118 = arith.constant 0 : index
    %361 = vector.load %arg5[%c19, %c0_118] : memref<32x128xf32, #tpu.memory_space<vmem>>, vector<1x64xf32>
    %362 = vector.broadcast %361 : vector<1x64xf32> to vector<24x64xf32>
    %363 = arith.addf %360, %362 : vector<24x64xf32>
    %364 = arith.mulf %363, %363 : vector<24x64xf32>
    %365 = arith.mulf %363, %364 : vector<24x64xf32>
    %cst_119 = arith.constant 4.471500e-02 : f32
    %366 = vector.broadcast %cst_119 : f32 to vector<24x64xf32>
    %367 = arith.mulf %366, %365 : vector<24x64xf32>
    %368 = arith.addf %363, %367 : vector<24x64xf32>
    %cst_120 = arith.constant 0.797884583 : f32
    %369 = vector.broadcast %cst_120 : f32 to vector<24x64xf32>
    %370 = arith.mulf %369, %368 : vector<24x64xf32>
    %371 = math.tanh %370 : vector<24x64xf32>
    %cst_121 = arith.constant 1.000000e+00 : f32
    %372 = vector.broadcast %cst_121 : f32 to vector<24x64xf32>
    %373 = arith.addf %372, %371 : vector<24x64xf32>
    %cst_122 = arith.constant 5.000000e-01 : f32
    %374 = vector.broadcast %cst_122 : f32 to vector<24x64xf32>
    %375 = arith.mulf %374, %373 : vector<24x64xf32>
    %376 = arith.mulf %363, %375 : vector<24x64xf32>
    %377 = arith.truncf %376 : vector<24x64xf32> to vector<24x64xbf16>
    %c536 = arith.constant 536 : index
    %c0_123 = arith.constant 0 : index
    %378 = vector.load %arg4[%c536, %c0_123] : memref<632x128xbf16, #tpu.memory_space<vmem>>, vector<64x32xbf16>
    %cst_124 = arith.constant dense<0.000000e+00> : vector<24x32xf32>
    %379 = tpu.matmul %377, %378, %cst_124 {dimension_numbers = #tpu.dot_dimension_numbers<[1], [0], [0], [1], [0, 0, 1, 1], [], []>} : vector<24x64xbf16>, vector<64x32xbf16>, vector<24x32xf32> -> vector<24x32xf32>
    %c20 = arith.constant 20 : index
    %c0_125 = arith.constant 0 : index
    %380 = vector.load %arg5[%c20, %c0_125] : memref<32x128xf32, #tpu.memory_space<vmem>>, vector<1x32xf32>
    %381 = vector.broadcast %380 : vector<1x32xf32> to vector<24x32xf32>
    %382 = arith.addf %379, %381 : vector<24x32xf32>
    %383 = arith.addf %335, %382 : vector<24x32xf32>
    %c22 = arith.constant 22 : index
    %c0_126 = arith.constant 0 : index
    %384 = vector.load %arg5[%c22, %c0_126] : memref<32x128xf32, #tpu.memory_space<vmem>>, vector<1x32xf32>
    %c23 = arith.constant 23 : index
    %c0_127 = arith.constant 0 : index
    %385 = vector.load %arg5[%c23, %c0_127] : memref<32x128xf32, #tpu.memory_space<vmem>>, vector<1x32xf32>
    %cst_128 = arith.constant dense<0.000000e+00> : vector<24xf32>
    %386 = vector.multi_reduction <add>, %383, %cst_128 [1] : vector<24x32xf32> to vector<24xf32>
    %387 = vector.shape_cast %386 : vector<24xf32> to vector<24x1xf32>
    %cst_129 = arith.constant 3.200000e+01 : f32
    %388 = vector.broadcast %cst_129 : f32 to vector<24x1xf32>
    %389 = arith.divf %387, %388 : vector<24x1xf32>
    %390 = vector.broadcast %389 : vector<24x1xf32> to vector<24x32xf32>
    %391 = arith.subf %383, %390 : vector<24x32xf32>
    %392 = arith.mulf %391, %391 : vector<24x32xf32>
    %cst_130 = arith.constant dense<0.000000e+00> : vector<24xf32>
    %393 = vector.multi_reduction <add>, %392, %cst_130 [1] : vector<24x32xf32> to vector<24xf32>
    %394 = vector.shape_cast %393 : vector<24xf32> to vector<24x1xf32>
    %cst_131 = arith.constant 3.200000e+01 : f32
    %395 = vector.broadcast %cst_131 : f32 to vector<24x1xf32>
    %396 = arith.divf %394, %395 : vector<24x1xf32>
    %cst_132 = arith.constant 9.99999974E-6 : f32
    %397 = vector.broadcast %cst_132 : f32 to vector<24x1xf32>
    %398 = arith.addf %396, %397 : vector<24x1xf32>
    %399 = math.rsqrt %398 : vector<24x1xf32>
    %400 = vector.broadcast %399 : vector<24x1xf32> to vector<24x32xf32>
    %401 = arith.mulf %391, %400 : vector<24x32xf32>
    %402 = vector.broadcast %384 : vector<1x32xf32> to vector<24x32xf32>
    %403 = arith.mulf %401, %402 : vector<24x32xf32>
    %404 = vector.broadcast %385 : vector<1x32xf32> to vector<24x32xf32>
    %405 = arith.addf %403, %404 : vector<24x32xf32>
    %406 = arith.truncf %405 : vector<24x32xf32> to vector<24x32xbf16>
    %c600 = arith.constant 600 : index
    %c0_133 = arith.constant 0 : index
    %407 = vector.load %arg4[%c600, %c0_133] : memref<632x128xbf16, #tpu.memory_space<vmem>>, vector<32x128xbf16>
    %cst_134 = arith.constant dense<0.000000e+00> : vector<24x128xf32>
    %408 = tpu.matmul %406, %407, %cst_134 {dimension_numbers = #tpu.dot_dimension_numbers<[1], [0], [0], [1], [0, 0, 1, 1], [], []>} : vector<24x32xbf16>, vector<32x128xbf16>, vector<24x128xf32> -> vector<24x128xf32>
    %c24 = arith.constant 24 : index
    %c0_135 = arith.constant 0 : index
    %409 = vector.load %arg5[%c24, %c0_135] : memref<32x128xf32, #tpu.memory_space<vmem>>, vector<1x128xf32>
    %410 = vector.broadcast %409 : vector<1x128xf32> to vector<24x128xf32>
    %411 = arith.addf %408, %410 : vector<24x128xf32>
    %c0_136 = arith.constant 0 : index
    %c0_137 = arith.constant 0 : index
    %412 = vector.load %arg6[%c0_136, %c0_137] : memref<24x128xf32, #tpu.memory_space<vmem>>, vector<24x128xf32>
    tpu.vector_store %arg6[%c0_136, %c0_137], %411 {strides = array<i32>} : memref<24x128xf32, #tpu.memory_space<vmem>>, vector<24x128xf32>,
    return
  }
}

</mosaic_0001>

<bundles_post_ra>
// kernel: eq.15
= control target key start
LH: loop header
LB: loop body
LE: loop exit
PB: predicated region body
PF: predicated region fallthrough
CT: control target
= control target key end

     0   :  { %vm7_vm0 = vcmask 31744   ;;  %vm13_vm1 = vcmask 64544   ;;  %s39_s0 = inlined_call_operand.vmem [shape: s32[2,4], index: 0, kind: input, shape index: {}]   ;;  %s40_s1 = inlined_call_operand.vmem [shape: s32[8], index: 1, kind: output, shape index: {}]  }
   0x1   :  { %v4_v0 = vld [vmem:[%s39_s0] sm:$0x3]  ;;  %s22_s0 = smov 4  }
   0x2   :  { %5 = vst [vmem:[#allocation1] sm:$0x3] %v4_v0 }
   0x9   :  { %v10_v1 = vld [vmem:[#allocation1 + $0x1] sm:$0x1]   ;;  %v6_v2 = vld [vmem:[#allocation1] sm:$0x1]  }
   0xa   :  { %11 = vrot.lane.b32.xlu0 %v10_v1, %s22_s0  ;;  %8 = vst.msk [vmem:[#allocation0] sm:$0x1] %vm7_vm0, %v6_v2  }
  0x7c   :  { %v12_v3 = vpop.permute.xlu0 %11  }
  0x7d   :  { %14 = vst.msk [vmem:[#allocation0] sm:$0x1] %vm13_vm1, %v12_v3  }
  0x84   :  { %v18_v4 = vld [vmem:[#allocation0] sm:$0x1] }
  0x85   :  { %20 = vst [vmem:[%s40_s1] sm:$0x1] %v18_v4 }

// kernel: tile.18
= control target key start
LH: loop header
LB: loop body
LE: loop exit
PB: predicated region body
PF: predicated region fallthrough
CT: control target
= control target key end

     0   :  { %s22_s0 = inlined_call_operand.vmem [shape: s32[8], index: 0, kind: input, shape index: {}]   ;;  %s23_s1 = inlined_call_operand.vmem [shape: s32[2,8], index: 1, kind: output, shape index: {}]  }
   0x1   :  { %v4_v0 = vld [vmem:[%s22_s0] ss:$0 sm:$0xff] }
   0x2   :  { %5 = vst [vmem:[%s23_s1] sm:$0x3] %v4_v0 }

// kernel: vlm_forward.1
= control target key start
LH: loop header
LB: loop body
LE: loop exit
PB: predicated region body
PF: predicated region fallthrough
CT: control target
= control target key end

     0   :  { %v3068_v0 = vmov 0   ;;  %vm129_vm0 = vcmask 523264   ;;  %vm177_vm1 = vcmask 1043456   ;;  %vm184_vm2 = vcmask 261120   ;;  %s3071_s14 = smov 64   ;;  %s3072_s15 = smov 96   ;;  %s3731_s4 = inlined_call_operand.vmem [shape: bf16[632,128], index: 4, kind: input, shape index: {}]   ;;  %s3732_s0 = inlined_call_operand.vmem [shape: f32[8,192], index: 0, kind: input, shape index: {}]   ;;  %s3733_s5 = inlined_call_operand.vmem [shape: f32[32,128], index: 5, kind: input, shape index: {}]   ;;  %s3734_s2 = inlined_call_operand.vmem [shape: s32[8,8], index: 2, kind: input, shape index: {}]   ;;  %s3735_s1 = inlined_call_operand.vmem [shape: s32[16,1], index: 1, kind: input, shape index: {}]   ;;  %s3736_s3 = inlined_call_operand.vmem [shape: s32[24,24], index: 3, kind: input, shape index: {}]   ;;  %s3737_s6 = inlined_call_operand.vmem [shape: f32[24,128], index: 6, kind: output, shape index: {}]  }
   0x1   :  { %133 = vmatprep.subr.bf16.mxu0 %v3068_v0  ;;  %v2934_v1 = vld [vmem:[%s3731_s4] sm:$0xff]   ;;  %2918 = vset.pattern.permute.xlu1 %v3068_v0  ;;  %v2935_v2 = vld [vmem:[%s3731_s4 + $0x8] sm:$0xff]   ;;  %v2936_v3 = vld [vmem:[%s3731_s4 + $0x10] sm:$0xff]   ;;  %v3069_v34 = vmov 0.0   ;;  %vm3070_vm3 = vmmov 0   ;;  %vm280_vm4 = vcmask 64512  }
   0x2   :  { %2917 = vset.pattern.permute.xlu0 %v3068_v0  ;;  %134 = vmatpush1.bf16.msra.mxu0 %v2934_v1  ;;  %v2937_v4 = vld [vmem:[%s3731_s4 + $0x18] sm:$0xff]   ;;  %v2938_v5 = vld [vmem:[%s3731_s4 + $0x20] sm:$0xff]   ;;  %v25_v6 = vld [vmem:[%s3732_s0 + $0x8] sm:$0xff]  ;;  %s3074_s18 = smov 120   ;;  %s3075_s19 = smov 56   ;;  %vm735_vm6 = vcmask 130048  }
   0x3   :  { %135 = vmatprep.subr.bf16.mxu0 %v3068_v0  ;;  %v27_v7 = vpack.c.bf16 %v25_v6, %v25_v6  ;;  %v2939_v8 = vld [vmem:[%s3731_s4 + $0x28] sm:$0xff]   ;;  %v2940_v9 = vld [vmem:[%s3731_s4 + $0x30] sm:$0xff]   ;;  %v2941_v10 = vld [vmem:[%s3731_s4 + $0x38] sm:$0xff]   ;;  %2676 = vmatprep.subr.bf16.mxu1 %v3069_v34  ;;  %s3076_s20 = smov 80   ;;  %s3077_s21 = smov 112   ;;  %vm737_vm7 = vcmask 195584  }
   0x4   :  { %v2942_v11 = vld [vmem:[%s3731_s4 + $0x40] sm:$0xff]   ;;  %v2943_v12 = vld [vmem:[%s3731_s4 + $0x48] sm:$0xff]   ;;  %v2944_v13 = vld [vmem:[%s3731_s4 + $0x50] sm:$0xff]   ;;  %2680 = vmatprep.mubr.msk.bf16.mxu1 %vm3070_vm3, %v3069_v34  ;;  %s3078_s22 = smov 72   ;;  %s3079_s23 = smov 104   ;;  %vm1096_vm10 = vcmask 457728  }
   0x5   :  { %2493 = vmatprep.mubr.msk.bf16.mxu0 %vm129_vm0, %v27_v7  ;;  %v2945_v14 = vld [vmem:[%s3731_s4 + $0x58] sm:$0xff]   ;;  %v24_v15 = vld [vmem:[%s3732_s0] sm:$0xff]  ;;  %v2947_v35 = vld [vmem:[%s3731_s4 + $0x68] sm:$0xff]   ;;  %s3080_s24 = smov 40   ;;  %s3081_s25 = smov 48  }
   0x6   :  { %136 = vmatpush1.bf16.msra.mxu0 %v2935_v2  ;;  %v26_v16 = vpack.c.bf16 %v24_v15, %v24_v15  ;;  %v173_v17 = vld [vmem:[%s3733_s5 + $0x1] sm:$0xf]  ;;  %v2480_v19 = vld [vmem:[%s3733_s5] ss:$0 sm:$0xff]  ;;  %v2494_v40 = vld [vmem:[%s3733_s5 + $0x5] ss:$0 sm:$0xff] }
   0x7   :  { %137 = vmatprep.subr.bf16.mxu0 %v3068_v0  ;;  %v175_v18 = vrot.slane %v173_v17, 4  ;;  %v2946_v33 = vld [vmem:[%s3731_s4 + $0x60] sm:$0xff]   ;;  %s3082_s26 = smov 8   ;;  %s3083_s30 = smov 16  }
   0x8   :  { %2677 = vmatpush3.bf16.msra.mxu1 %v2946_v33  ;;  %v2495_v42 = vld [vmem:[%s3733_s5 + $0x6] ss:$0 sm:$0xff]  ;;  %v2496_v46 = vld [vmem:[%s3733_s5 + $0x7] ss:$0 sm:$0xff]  ;;  %s3084_s7 = smov 24  }
   0x9   :  { %v178_v21 = vsel %vm177_vm1, %v173_v17, %v175_v18  ;;  %2678 = vmatprep.subr.bf16.mxu1 %v3069_v34  ;;  %v3221_v59 = vld [vmem:[%s3734_s2] sm:$0xff]  ;;  %s3073_s2 = smov 88  }
   0xa   :  { %138 = vmatpush1.bf16.msra.mxu0 %v2936_v3  ;;  %vm181_vm5 = vcmp.gt.s32.totalorder %v3221_v59, 0 }
   0xb   :  { %139 = vmatprep.subr.bf16.mxu0 %v3068_v0 }
   0xc   :  { %2679 = vmatpush3.bf16.msra.mxu1 %v2947_v35 }
   0xd   :  { %2684 = vmatprep.subr.bf16.mxu1 %v3069_v34 }
   0xe   :  { %140 = vmatpush1.bf16.msra.mxu0 %v2937_v4 }
   0xf   :  { %141 = vmatprep.subr.bf16.mxu0 %v3068_v0 }
  0x12   :  { %142 = vmatpush1.bf16.msra.mxu0 %v2938_v5 }
  0x13   :  { %143 = vmatprep.subr.bf16.mxu0 %v3068_v0 }
  0x16   :  { %144 = vmatpush1.bf16.msra.mxu0 %v2939_v8 }
  0x17   :  { %145 = vmatprep.subr.bf16.mxu0 %v3068_v0 }
  0x1a   :  { %146 = vmatpush1.bf16.msra.mxu0 %v2940_v9 }
  0x1b   :  { %147 = vmatprep.subr.bf16.mxu0 %v3068_v0 }
  0x1e   :  { %148 = vmatpush1.bf16.msra.mxu0 %v2941_v10 }
  0x1f   :  { %149 = vmatprep.subr.bf16.mxu0 %v3068_v0 }
  0x22   :  { %150 = vmatpush1.bf16.msra.mxu0 %v2942_v11 }
  0x23   :  { %151 = vmatprep.subr.bf16.mxu0 %v3068_v0 }
  0x26   :  { %152 = vmatpush1.bf16.msra.mxu0 %v2943_v12 }
  0x27   :  { %153 = vmatprep.subr.bf16.mxu0 %v3068_v0 }
  0x2a   :  { %154 = vmatpush1.bf16.msra.mxu0 %v2944_v13 }
  0x2b   :  { %155 = vmatprep.subr.bf16.mxu0 %v3068_v0 }
  0x2e   :  { %156 = vmatpush1.bf16.msra.mxu0 %v2945_v14 }
  0x2f   :  { %2714 = vmatprep.subr.bf16.mxu0 %v3069_v34 }
  0x31   :  { %166 = vmatmul.mubr.bf16.vlgmr.msra.gmra.mrb[0].mxu0 %v26_v16 }
  0x32   :  { %2716 = vmatprep.mubr.msk.bf16.mxu0 %vm3070_vm3, %v3069_v34 }
 0x104   :  { %v167_v20 = vpop.f32.mrb[0].mxu0 }
 0x105   :  { %v168_v22 = vadd.f32 %v2480_v19, %v167_v20  ;;  %v169_v23 = vpop.f32.mrb[1].mxu0 }
 0x106   :  { %v170_v24 = vpop.f32.mrb[2].mxu0 }
 0x107   :  { %v3170_v25 = vadd.f32 %v178_v21, %v168_v22  ;;  %v171_v26 = vpop.f32.mrb[3].mxu0 }
 0x109   :  { %v185_v27 = vsel %vm184_vm2, %v3170_v25, 0.0 }
 0x10a   :  { %186 = vadd.xlane.f32.xlu0 %v185_v27 }
 0x197   :  { %v187_v28 = vpop.xlane.xlu0 %186 }
 0x198   :  { %v189_v29 = vmul.f32 0.03125, %v187_v28 }
 0x19a   :  { %v190_v30 = vsub.f32 %v3170_v25, %v189_v29 }
 0x19c   :  { %v191_v31 = vmul.f32 %v190_v30, %v190_v30 }
 0x19e   :  { %v192_v32 = vsel %vm184_vm2, %v191_v31, 0.0 }
 0x19f   :  { %193 = vadd.xlane.f32.xlu0 %v192_v32 }
 0x22c   :  { %v194_v36 = vpop.xlane.xlu0 %193 }
 0x22d   :  { %v195_v37 = vmul.f32 0.03125, %v194_v36 }
 0x22f   :  { %v196_v38 = vadd.f32 1e-05, %v195_v37 }
 0x231   :  { %2974 = vrsqrt.f32 %v196_v38 }
 0x23b   :  { %v2975_v39 = vpop.eup %2974 }
 0x23c   :  { %v198_v41 = vmul.f32 %v2975_v39, %v190_v30 }
 0x23e   :  { %v203_v43 = vmul.f32 %v2494_v40, %v198_v41 }
 0x240   :  { %v208_v44 = vadd.f32 %v2495_v42, %v203_v43 }
 0x242   :  { %v209_v45 = vpack.c.bf16 %v208_v44, %v208_v44 }
 0x244   :  { %2681 = vmatmul.mubr.msk.bf16.vlgmr.msra.gmra.mrb[0].mxu1 %vm184_vm2, %v209_v45 }
 0x245   :  { %2686 = vmatprep.mubr.msk.bf16.mxu1 %vm3070_vm3, %v3069_v34 }
 0x317   :  { %v268_v47 = vpop.f32.mrb[0].mxu1 }
 0x318   :  { %v269_v48 = vadd.f32 %v2496_v46, %v268_v47  ;;  %v2682_v49 = vpop.f32.mrb[1].mxu1 }
 0x319   :  { %v271_v50 = vpop.f32.mrb[2].mxu1 }
 0x31a   :  { %v3202_v51 = vpack.c.bf16 %v269_v48, %v269_v48  ;;  %v2683_v52 = vpop.f32.mrb[3].mxu1  ;;  %v274_v55 = vmul.f32 0.35355338, %v269_v48 }
 0x31c   :  { %340 = vrot.lane.b32.xlu0 %v3202_v51, %s3071_s14  ;;  %278 = vrot.lane.b32.xlu1 %v3202_v51, %s3072_s15  ;;  %v3210_v57 = vpack.c.bf16 %v274_v55, %v274_v55 }
 0x38e   :  { %v279_v53 = vpop.permute.xlu1 %278  ;;  %v341_v56 = vpop.permute.xlu0 %340 }
 0x38f   :  { %v285_v54 = vsel %vm280_vm4, %v279_v53, 0  ;;  %v346_v58 = vsel %vm177_vm1, %v341_v56, 0 }
 0x390   :  { %2685 = vmatpush3.bf16.xpose.msra.mxu1 %v285_v54 }
 0x391   :  { %2690 = vmatprep.subr.bf16.mxu1 %v3069_v34 }
 0x397   :  { %2687 = vmatmul.mubr.msk.bf16.vlgmr.msra.gmra.mrb[4].mxu1 %vm280_vm4, %v3210_v57 }
 0x398   :  { %2691 = vmatpush3.bf16.msra.mxu1 %v346_v58  ;;  %2692 = vmatprep.mubr.msk.bf16.mxu1 %vm3070_vm3, %v3069_v34 }
 0x399   :  { %2696 = vmatprep.subr.bf16.mxu1 %v3069_v34 }
 0x46a   :  { %v321_v60 = vpop.f32.mrb[4].mxu1 }
 0x46b   :  { %v327_v61 = vsel %vm181_vm5, %v321_v60, -1e+30  ;;  %v2688_v62 = vpop.f32.mrb[5].mxu1 }
 0x46c   :  { %v324_v63 = vpop.f32.mrb[6].mxu1  ;;  %v328_v0 = vsel %vm280_vm4, %v327_v61, -inf }
 0x46d   :  { %329 = vmax.xlane.f32.xlu1 %v328_v0  ;;  %v2689_v1 = vpop.f32.mrb[7].mxu1 }
 0x4fa   :  { %v330_v2 = vpop.xlane.xlu1 %329 }
 0x4fb   :  { %v331_v3 = vsub.f32 %v327_v61, %v330_v2 }
 0x4fd   :  { %v332_v4 = vmul.f32 1.442695, %v331_v3 }
 0x4ff   :  { %2976 = vpow2.f32 %v332_v4 }
 0x509   :  { %v2977_v5 = vpop.eup %2976 }
 0x50a   :  { %v334_v6 = vsel %vm280_vm4, %v2977_v5, 0.0 }
 0x50b   :  { %335 = vadd.xlane.f32.xlu0 %v334_v6 }
 0x521   :  { %391 = vrot.lane.b32.xlu0 %v3202_v51, %s3073_s2 }
 0x525   :  { %389 = vrot.lane.b32.xlu0 %v3210_v57, %s3074_s18 }
 0x598   :  { %v336_v7 = vpop.xlane.xlu0 %335 }
 0x599   :  { %2978 = vrcp.f32 %v336_v7 }
 0x59c   :  { %v392_v10 = vpop.permute.xlu0 %391 }
 0x59d   :  { %v397_v12 = vsel %vm280_vm4, %v392_v10, 0 }
 0x5a0   :  { %v390_v13 = vpop.permute.xlu0 %389 }
 0x5a3   :  { %v2979_v8 = vpop.eup %2978 }
 0x5a4   :  { %v338_v9 = vmul.f32 %v2979_v8, %v2977_v5 }
 0x5a6   :  { %v339_v11 = vpack.c.bf16 %v338_v9, %v338_v9 }
 0x5a8   :  { %2693 = vmatmul.mubr.msk.bf16.vlgmr.msra.gmra.mrb[8].mxu1 %vm280_vm4, %v339_v11 }
 0x5a9   :  { %2697 = vmatpush3.bf16.xpose.msra.mxu1 %v397_v12  ;;  %2698 = vmatprep.mubr.msk.bf16.mxu1 %vm3070_vm3, %v3069_v34 }
 0x5aa   :  { %2702 = vmatprep.subr.bf16.mxu1 %v3069_v34 }
 0x5b0   :  { %2699 = vmatmul.mubr.msk.bf16.vlgmr.msra.gmra.mrb[12].mxu1 %vm280_vm4, %v390_v13 }
 0x5b1   :  { %2704 = vmatprep.mubr.msk.bf16.mxu1 %vm3070_vm3, %v3069_v34 }
 0x67b   :  { %v3240_v14 = vpop.f32.mrb[8].mxu1 }
 0x67c   :  { %v2694_v15 = vpop.f32.mrb[9].mxu1 }
 0x67d   :  { %v385_v16 = vpop.f32.mrb[10].mxu1 }
 0x67e   :  { %v2695_v17 = vpop.f32.mrb[11].mxu1 }
 0x683   :  { %v433_v18 = vpop.f32.mrb[12].mxu1 }
 0x684   :  { %v439_v19 = vsel %vm181_vm5, %v433_v18, -1e+30  ;;  %v2700_v20 = vpop.f32.mrb[13].mxu1  ;;  %v2948_v18 = vld [vmem:[%s3731_s4 + $0x70] sm:$0xff]  }
 0x685   :  { %v436_v21 = vpop.f32.mrb[14].mxu1  ;;  %v440_v22 = vsel %vm280_vm4, %v439_v19, -inf }
 0x686   :  { %441 = vmax.xlane.f32.xlu1 %v440_v22  ;;  %v2701_v23 = vpop.f32.mrb[15].mxu1 }
 0x697   :  { %452 = vrot.lane.b32.xlu1 %v3202_v51, %s3075_s19 }
 0x69b   :  { %502 = vrot.lane.b32.xlu1 %v3202_v51, %s3076_s20 }
 0x69f   :  { %500 = vrot.lane.b32.xlu1 %v3210_v57, %s3077_s21 }
 0x6a3   :  { %613 = vrot.lane.b32.xlu1 %v3202_v51, %s3078_s22 }
 0x713   :  { %v442_v24 = vpop.xlane.xlu1 %441 }
 0x714   :  { %v443_v26 = vsub.f32 %v439_v19, %v442_v24  ;;  %v2949_v19 = vld [vmem:[%s3731_s4 + $0x78] sm:$0xff]  }
 0x716   :  { %v444_v27 = vmul.f32 1.442695, %v443_v26 }
 0x717   :  { %v453_v28 = vpop.permute.xlu1 %452 }
 0x718   :  { %2980 = vpow2.f32 %v444_v27  ;;  %v458_v29 = vsel %vm177_vm1, %v453_v28, 0 }
 0x719   :  { %2703 = vmatpush3.bf16.msra.mxu1 %v458_v29 }
 0x71a   :  { %2708 = vmatprep.subr.bf16.mxu1 %v3069_v34 }
 0x71b   :  { %v503_v33 = vpop.permute.xlu1 %502 }
 0x71c   :  { %v508_v39 = vsel %vm280_vm4, %v503_v33, 0 }
 0x71f   :  { %v501_v38 = vpop.permute.xlu1 %500 }
 0x722   :  { %v2981_v30 = vpop.eup %2980 }
 0x723   :  { %v446_v31 = vsel %vm280_vm4, %v2981_v30, 0.0  ;;  %v614_v40 = vpop.permute.xlu1 %613 }
 0x724   :  { %447 = vadd.xlane.f32.xlu0 %v446_v31  ;;  %v619_v41 = vsel %vm280_vm4, %v614_v40, 0 }
 0x73a   :  { %611 = vrot.lane.b32.xlu0 %v3210_v57, %s3079_s23 }
 0x7b1   :  { %v448_v32 = vpop.xlane.xlu0 %447 }
 0x7b2   :  { %2982 = vrcp.f32 %v448_v32 }
 0x7b5   :  { %v612_v42 = vpop.permute.xlu0 %611 }
 0x7bc   :  { %v2983_v35 = vpop.eup %2982 }
 0x7bd   :  { %v450_v36 = vmul.f32 %v2983_v35, %v2981_v30 }
 0x7bf   :  { %v451_v37 = vpack.c.bf16 %v450_v36, %v450_v36 }
 0x7c1   :  { %2705 = vmatmul.mubr.msk.bf16.vlgmr.msra.gmra.mrb[16].mxu1 %vm280_vm4, %v451_v37  ;;  %v2508_v37 = vld [vmem:[%s3733_s5 + $0x8] ss:$0 sm:$0xff] }
 0x7c2   :  { %2709 = vmatpush3.bf16.xpose.msra.mxu1 %v508_v39  ;;  %2710 = vmatprep.mubr.msk.bf16.mxu1 %vm3070_vm3, %v3069_v34 }
 0x7c3   :  { %2720 = vmatprep.subr.bf16.mxu1 %v3069_v34 }
 0x7c9   :  { %2711 = vmatmul.mubr.msk.bf16.vlgmr.msra.gmra.mrb[20].mxu1 %vm280_vm4, %v501_v38 }
 0x7ca   :  { %2721 = vmatpush3.bf16.xpose.msra.mxu1 %v619_v41  ;;  %2722 = vmatprep.mubr.msk.bf16.mxu1 %vm3070_vm3, %v3069_v34 }
 0x7cb   :  { %2732 = vmatprep.subr.bf16.mxu1 %v3069_v34 }
 0x7d1   :  { %2723 = vmatmul.mubr.msk.bf16.vlgmr.msra.gmra.mrb[24].mxu1 %vm280_vm4, %v612_v42 }
 0x7d2   :  { %2736 = vmatprep.mubr.msk.bf16.mxu1 %vm3070_vm3, %v3069_v34  ;;  %2733 = vmatpush3.bf16.msra.mxu1 %v2948_v18 }
 0x7d3   :  { %2734 = vmatprep.subr.bf16.mxu1 %v3069_v34 }
 0x7d6   :  { %2735 = vmatpush3.bf16.msra.mxu1 %v2949_v19 }
 0x7d7   :  { %2748 = vmatprep.subr.bf16.mxu1 %v3069_v34 }
 0x894   :  { %v494_v43 = vpop.f32.mrb[16].mxu1 }
 0x895   :  { %v2706_v44 = vpop.f32.mrb[17].mxu1 }
 0x896   :  { %v497_v45 = vpop.f32.mrb[18].mxu1 }
 0x897   :  { %v2707_v46 = vpop.f32.mrb[19].mxu1 }
 0x89c   :  { %v544_v47 = vpop.f32.mrb[20].mxu1 }
 0x89d   :  { %v550_v48 = vsel %vm181_vm5, %v544_v47, -1e+30  ;;  %v2712_v49 = vpop.f32.mrb[21].mxu1 }
 0x89e   :  { %v547_v50 = vpop.f32.mrb[22].mxu1  ;;  %v551_v52 = vsel %vm280_vm4, %v550_v48, -inf  ;;  %v2950_v49 = vld [vmem:[%s3731_s4 + $0x80] sm:$0xff]  }
 0x89f   :  { %552 = vmax.xlane.f32.xlu1 %v551_v52  ;;  %v2713_v53 = vpop.f32.mrb[23].mxu1 }
 0x8a4   :  { %v655_v54 = vpop.f32.mrb[24].mxu1 }
 0x8a5   :  { %v661_v55 = vsel %vm181_vm5, %v655_v54, -1e+30  ;;  %v2724_v56 = vpop.f32.mrb[25].mxu1 }
 0x8a6   :  { %v658_v57 = vpop.f32.mrb[26].mxu1  ;;  %v662_v58 = vsel %vm280_vm4, %v661_v55, -inf }
 0x8a7   :  { %663 = vmax.xlane.f32.xlu0 %v662_v58  ;;  %v2725_v60 = vpop.f32.mrb[27].mxu1  ;;  %v2513_v57 = vld [vmem:[%s3733_s5 + $0xa] ss:$0 sm:$0xff] }
 0x8bd   :  { %674 = vrot.lane.b32.xlu0 %v3202_v51, %s3080_s24 }
 0x92c   :  { %v553_v61 = vpop.xlane.xlu1 %552 }
 0x92d   :  { %v554_v62 = vsub.f32 %v550_v48, %v553_v61 }
 0x92f   :  { %v555_v63 = vmul.f32 1.442695, %v554_v62  ;;  %v2952_v62 = vld [vmem:[%s3731_s4 + $0x90] sm:$0xff]  }
 0x931   :  { %2984 = vpow2.f32 %v555_v63  ;;  %v2953_v63 = vld [vmem:[%s3731_s4 + $0x98] sm:$0xff]  }
 0x934   :  { %v664_v0 = vpop.xlane.xlu0 %663 }
 0x935   :  { %v665_v1 = vsub.f32 %v661_v55, %v664_v0  ;;  %v2512_v55 = vld [vmem:[%s3733_s5 + $0x9] ss:$0 sm:$0xff]  ;;  %v2954_v0 = vld [vmem:[%s3731_s4 + $0xa0] sm:$0xff]  }
 0x937   :  { %v666_v2 = vmul.f32 1.442695, %v665_v1  ;;  %v2955_v1 = vld [vmem:[%s3731_s4 + $0xa8] sm:$0xff]  }
 0x938   :  { %v675_v12 = vpop.permute.xlu0 %674 }
 0x939   :  { %2986 = vpow2.f32 %v666_v2  ;;  %v680_v15 = vsel %vm177_vm1, %v675_v12, 0  ;;  %v2956_v2 = vld [vmem:[%s3731_s4 + $0xb0] sm:$0xff]  }
 0x93b   :  { %v2985_v59 = vpop.eup %2984 }
 0x93c   :  { %v557_v3 = vsel %vm280_vm4, %v2985_v59, 0.0 }
 0x93d   :  { %558 = vadd.xlane.f32.xlu1 %v557_v3  ;;  %v1051_v3 = vld [vmem:[%s3735_s1] sm:$0xff] }
 0x943   :  { %v2987_v4 = vpop.eup %2986 }
 0x944   :  { %v668_v5 = vsel %vm280_vm4, %v2987_v4, 0.0 }
 0x945   :  { %669 = vadd.xlane.f32.xlu1 %v668_v5 }
 0x956   :  { %563 = vrot.lane.b32.xlu1 %v3202_v51, %s3081_s25 }
 0x95a   :  { %723 = vrot.lane.b32.xlu1 %v494_v43, %s3082_s26 }
 0x9ca   :  { %v559_v6 = vpop.xlane.xlu1 %558 }
 0x9cb   :  { %2988 = vrcp.f32 %v559_v6 }
 0x9d2   :  { %v670_v7 = vpop.xlane.xlu1 %669 }
 0x9d3   :  { %2990 = vrcp.f32 %v670_v7 }
 0x9d5   :  { %v2989_v8 = vpop.eup %2988 }
 0x9d6   :  { %v561_v9 = vmul.f32 %v2989_v8, %v2985_v59  ;;  %v564_v10 = vpop.permute.xlu1 %563  ;;  %v1052_v59 = vld [vmem:[%s3735_s1 + $0x8] sm:$0xff] }
 0x9d7   :  { %v569_v11 = vsel %vm177_vm1, %v564_v10, 0 }
 0x9d8   :  { %2715 = vmatpush3.bf16.msra.mxu0 %v569_v11  ;;  %v562_v13 = vpack.c.bf16 %v561_v9, %v561_v9 }
 0x9d9   :  { %2726 = vmatprep.subr.bf16.mxu0 %v3069_v34 }
 0x9da   :  { %v724_v29 = vpop.permute.xlu1 %723 }
 0x9db   :  { %2717 = vmatmul.mubr.msk.bf16.vlgmr.msra.gmra.mrb[4].mxu0 %vm280_vm4, %v562_v13  ;;  %v734_v31 = vsel %vm280_vm4, %v3240_v14, %v724_v29  ;;  %v2958_v29 = vld [vmem:[%s3731_s4 + $0xc0] sm:$0xff]  }
 0x9dc   :  { %2727 = vmatpush3.bf16.msra.mxu0 %v680_v15  ;;  %2728 = vmatprep.mubr.msk.bf16.mxu0 %vm3070_vm3, %v3069_v34 }
 0x9dd   :  { %v2991_v51 = vpop.eup %2990  ;;  %2740 = vmatprep.subr.bf16.mxu0 %v3069_v34 }
 0x9de   :  { %v672_v16 = vmul.f32 %v2991_v51, %v2987_v4  ;;  %v2514_v4 = vld [vmem:[%s3733_s5 + $0xb] ss:$0 sm:$0xff] }
 0x9e0   :  { %v673_v17 = vpack.c.bf16 %v672_v16, %v672_v16 }
 0x9e3   :  { %2729 = vmatmul.mubr.msk.bf16.vlgmr.msra.gmra.mrb[8].mxu0 %vm280_vm4, %v673_v17 }
 0x9e4   :  { %2744 = vmatprep.mubr.msk.bf16.mxu0 %vm3070_vm3, %v3069_v34  ;;  %2741 = vmatpush3.bf16.msra.mxu0 %v2950_v49 }
 0x9e5   :  { %2742 = vmatprep.subr.bf16.mxu0 %v3069_v34 }
 0xaae   :  { %v605_v20 = vpop.f32.mrb[4].mxu0 }
 0xaaf   :  { %727 = vrot.lane.b32.xlu1 %v605_v20, %s3083_s30  ;;  %v2718_v21 = vpop.f32.mrb[5].mxu0  ;;  %v2957_v20 = vld [vmem:[%s3731_s4 + $0xb8] sm:$0xff]  }
 0xab0   :  { %v608_v22 = vpop.f32.mrb[6].mxu0  ;;  %v2518_v21 = vld [vmem:[%s3733_s5 + $0xc] ss:$0 sm:$0xff] }
 0xab1   :  { %v2719_v23 = vpop.f32.mrb[7].mxu0 }
 0xab6   :  { %v716_v24 = vpop.f32.mrb[8].mxu0 }
 0xab7   :  { %731 = vrot.lane.b32.xlu1 %v716_v24, %s3084_s7  ;;  %v2730_v26 = vpop.f32.mrb[9].mxu0 }
 0xab8   :  { %v719_v27 = vpop.f32.mrb[10].mxu0 }
 0xab9   :  { %v2731_v28 = vpop.f32.mrb[11].mxu0 }
 0xb21   :  { %v728_v30 = vpop.permute.xlu1 %727 }
 0xb22   :  { %v736_v32 = vsel %vm735_vm6, %v734_v31, %v728_v30  ;;  %v1053_v31 = vlaneseq }
 0xb29   :  { %v732_v33 = vpop.permute.xlu1 %731 }
 0xb2a   :  { %v738_v35 = vsel %vm737_vm7, %v736_v32, %v732_v33  ;;  %v2959_v32 = vld [vmem:[%s3731_s4 + $0xc8] sm:$0xff]   ;;  %v1054_v33 = vand.u32 127, %v1053_v31 }
 0xb2b   :  { %v739_v36 = vpack.c.bf16 %v738_v35, %v738_v35 }
 0xb2d   :  { %2737 = vmatmul.mubr.msk.bf16.vlgmr.msra.gmra.mrb[28].mxu1 %vm184_vm2, %v739_v36 }
 0xb2e   :  { %2756 = vmatprep.mubr.msk.bf16.mxu1 %vm3070_vm3, %v3069_v34  ;;  %2749 = vmatpush3.bf16.msra.mxu1 %v2952_v62 }
 0xb2f   :  { %2750 = vmatprep.subr.bf16.mxu1 %v3069_v34 }
 0xb32   :  { %2751 = vmatpush3.bf16.msra.mxu1 %v2953_v63 }
 0xb33   :  { %2752 = vmatprep.subr.bf16.mxu1 %v3069_v34 }
 0xb36   :  { %2753 = vmatpush3.bf16.msra.mxu1 %v2954_v0 }
 0xb37   :  { %2754 = vmatprep.subr.bf16.mxu1 %v3069_v34 }
 0xb3a   :  { %2755 = vmatpush3.bf16.msra.mxu1 %v2955_v1 }
 0xc00   :  { %v798_v38 = vpop.f32.mrb[28].mxu1 }
 0xc01   :  { %v799_v39 = vadd.f32 %v2508_v37, %v798_v38  ;;  %v2738_v40 = vpop.f32.mrb[29].mxu1  ;;  %v2960_v37 = vld [vmem:[%s3731_s4 + $0xd0] sm:$0xff]   ;;  %v2961_v38 = vld [vmem:[%s3731_s4 + $0xd8] ss:$0 sps:$4 sm:$0xff]  }
 0xc02   :  { %v801_v41 = vpop.f32.mrb[30].mxu1 }
 0xc03   :  { %v3315_v14 = vadd.f32 %v799_v39, %v3170_v25  ;;  %v2739_v42 = vpop.f32.mrb[31].mxu1  ;;  %v2951_v25 = vld [vmem:[%s3731_s4 + $0x88] sm:$0xff]   ;;  %v1101_v41 = vsel %vm177_vm1, %v2961_v38, 0 }
 0xc04   :  { %2743 = vmatpush3.bf16.msra.mxu0 %v2951_v25  ;;  %v2524_v42 = vld [vmem:[%s3733_s5 + $0x15] ss:$0 sm:$0xff] }
 0xc05   :  { %v807_v43 = vsel %vm184_vm2, %v3315_v14, 0.0  ;;  %2760 = vmatprep.subr.bf16.mxu0 %v3069_v34 }
 0xc06   :  { %808 = vadd.xlane.f32.xlu1 %v807_v43 }
 0xc17   :  { %1059 = vperm.xlu1 %2918, %v1052_v59  }
 0xc93   :  { %v809_v44 = vpop.xlane.xlu1 %808 }
 0xc94   :  { %v810_v45 = vmul.f32 0.03125, %v809_v44 }
 0xc96   :  { %v811_v46 = vsub.f32 %v3315_v14, %v810_v45 }
 0xc97   :  { %v1060_v36 = vpop.permute.xlu1 %1059 }
 0xc98   :  { %v812_v47 = vmul.f32 %v811_v46, %v811_v46  ;;  %vm1062_vm9 = vcmp.eq.s32.totalorder %v1060_v36, %v1054_v33 }
 0xc99   :  { %v2529_v40 = vsel %vm1062_vm9, 1.0, %v3069_v34 }
 0xc9a   :  { %v813_v48 = vsel %vm184_vm2, %v812_v47, 0.0 }
 0xc9b   :  { %814 = vadd.xlane.f32.xlu0 %v813_v48 }
 0xcb1   :  { %1056 = vperm.xlu0 %2917, %v1051_v3  }
 0xd28   :  { %v815_v50 = vpop.xlane.xlu0 %814 }
 0xd29   :  { %v816_v52 = vmul.f32 0.03125, %v815_v50 }
 0xd2b   :  { %v817_v53 = vadd.f32 1e-05, %v816_v52 }
 0xd2d   :  { %2992 = vrsqrt.f32 %v817_v53 }
 0xd30   :  { %v1057_v35 = vpop.permute.xlu0 %1056 }
 0xd31   :  { %vm1061_vm8 = vcmp.eq.s32.totalorder %v1057_v35, %v1054_v33  ;;  %v2537_v33 = vld [vmem:[%s3733_s5 + $0xf] ss:$0 sm:$0xff] }
 0xd32   :  { %v2528_v39 = vsel %vm1061_vm8, 1.0, %v3069_v34 }
 0xd37   :  { %v2993_v54 = vpop.eup %2992 }
 0xd38   :  { %v819_v56 = vmul.f32 %v2993_v54, %v811_v46 }
 0xd3a   :  { %v824_v58 = vmul.f32 %v2512_v55, %v819_v56 }
 0xd3c   :  { %v829_v60 = vadd.f32 %v2513_v57, %v824_v58 }
 0xd3e   :  { %v830_v61 = vpack.c.bf16 %v829_v60, %v829_v60 }
 0xd40   :  { %2745 = vmatmul.mubr.msk.bf16.vlgmr.msra.gmra.mrb[12].mxu0 %vm184_vm2, %v830_v61 }
 0xd41   :  { %2764 = vmatprep.mubr.msk.bf16.mxu0 %vm3070_vm3, %v3069_v34  ;;  %2761 = vmatpush3.bf16.msra.mxu0 %v2956_v2 }
 0xd42   :  { %2762 = vmatprep.subr.bf16.mxu0 %v3069_v34 }
 0xd45   :  { %2763 = vmatpush3.bf16.msra.mxu0 %v2957_v20 }
 0xd46   :  { %2768 = vmatprep.subr.bf16.mxu0 %v3069_v34 }
 0xe13   :  { %v889_v5 = vpop.f32.mrb[12].mxu0 }
 0xe14   :  { %v890_v6 = vadd.f32 %v2514_v4, %v889_v5  ;;  %v2746_v7 = vpop.f32.mrb[13].mxu0  ;;  %v2962_v5 = vld [vmem:[%s3731_s4 + $0xdc] sm:$0xff]  }
 0xe15   :  { %v892_v8 = vpop.f32.mrb[14].mxu0  ;;  %2780 = vmatprep.subr.bf16.mxu1 %v2962_v5 }
 0xe16   :  { %v895_v9 = vmul.f32 %v890_v6, %v890_v6  ;;  %v2747_v10 = vpop.f32.mrb[15].mxu0 }
 0xe18   :  { %v896_v11 = vmul.f32 %v895_v9, %v890_v6 }
 0xe1a   :  { %v897_v12 = vmul.f32 0.044715, %v896_v11 }
 0xe1c   :  { %v898_v13 = vadd.f32 %v897_v12, %v890_v6 }
 0xe1e   :  { %v899_v15 = vmul.f32 0.7978846, %v898_v13 }
 0xe20   :  { %2994 = vtanh.f32 %v899_v15 }
 0xe2a   :  { %v2995_v51 = vpop.eup %2994 }
 0xe2b   :  { %v901_v16 = vadd.f32 1.0, %v2995_v51 }
 0xe2d   :  { %v902_v17 = vmul.f32 0.5, %v901_v16 }
 0xe2f   :  { %v903_v18 = vmul.f32 %v902_v17, %v890_v6  ;;  %v2963_v6 = vld [vmem:[%s3731_s4 + $0xe4] sm:$0xff]  }
 0xe31   :  { %v904_v19 = vpack.c.bf16 %v903_v18, %v903_v18  ;;  %v2535_v18 = vld [vmem:[%s3733_s5 + $0xd] ss:$0 sm:$0xff] }
 0xe33   :  { %2757 = vmatmul.mubr.msk.bf16.vlgmr.msra.gmra.mrb[32].mxu1 %vm129_vm0, %v904_v19 }
 0xe34   :  { %2781 = vmatpush3.bf16.msra.mxu1 %v2962_v5 }
 0xe35   :  { %2782 = vmatprep.subr.bf16.mxu1 %v2963_v6 }
 0xe38   :  { %2783 = vmatpush3.bf16.msra.mxu1 %v2963_v6 }
 0xf06   :  { %v979_v22 = vpop.f32.mrb[32].mxu1 }
 0xf07   :  { %v980_v23 = vadd.f32 %v2518_v21, %v979_v22  ;;  %v2758_v24 = vpop.f32.mrb[33].mxu1  ;;  %v2536_v22 = vld [vmem:[%s3733_s5 + $0xe] ss:$0 sm:$0xff] }
 0xf08   :  { %v982_v26 = vpop.f32.mrb[34].mxu1 }
 0xf09   :  { %v985_v27 = vadd.f32 %v980_v23, %v3315_v14  ;;  %v2759_v28 = vpop.f32.mrb[35].mxu1  ;;  %v1067_v14 = vpack.c.bf16 %v2529_v40, %v2528_v39 }
 0xf0b   :  { %v986_v30 = vpack.c.bf16 %v985_v27, %v985_v27 }
 0xf0d   :  { %2765 = vmatmul.mubr.msk.bf16.vlgmr.msra.gmra.mrb[16].mxu0 %vm184_vm2, %v986_v30 }
 0xf0e   :  { %2769 = vmatpush3.bf16.msra.mxu0 %v2958_v29  ;;  %2776 = vmatprep.mubr.msk.bf16.mxu0 %vm3070_vm3, %v3069_v34 }
 0xf0f   :  { %2770 = vmatprep.subr.bf16.mxu0 %v3069_v34 }
 0xf12   :  { %2771 = vmatpush3.bf16.msra.mxu0 %v2959_v32 }
 0xf13   :  { %2772 = vmatprep.subr.bf16.mxu0 %v3069_v34 }
 0xf16   :  { %2773 = vmatpush3.bf16.msra.mxu0 %v2960_v37 }
 0xf17   :  { %2774 = vmatprep.subr.bf16.mxu0 %v3069_v34 }
 0xf1a   :  { %2775 = vmatpush3.bf16.msra.mxu0 %v1101_v41 }
 0xf1d   :  { %2777 = vmatmul.mubr.msk.bf16.vlgmr.msra.gmra.mrb[20].mxu0 %vm1096_vm10, %v1067_v14 }
 0xfe0   :  { %v1045_v43 = vpop.f32.mrb[16].mxu0 }
 0xfe1   :  { %v3399_v44 = vadd.f32 %v2524_v42, %v1045_v43  ;;  %v2766_v45 = vpop.f32.mrb[17].mxu0 }
 0xfe2   :  { %v1048_v46 = vpop.f32.mrb[18].mxu0 }
 0xfe3   :  { %v2767_v47 = vpop.f32.mrb[19].mxu0  ;;  %v1152_v48 = vsel %vm184_vm2, %v3399_v44, 0.0 }
 0xfe4   :  { %1153 = vadd.xlane.f32.xlu1 %v1152_v48 }
 0xff0   :  { %v3403_v34 = vpop.f32.mrb[20].mxu0 }
 0xff1   :  { %v2778_v49 = vpop.f32.mrb[21].mxu0  ;;  %v1155_v25 = vsel %vm184_vm2, %v3403_v34, 0.0 }
 0xff2   :  { %1156 = vadd.xlane.f32.xlu0 %v1155_v25  ;;  %v3407_v50 = vpop.f32.mrb[22].mxu0 }
 0xff3   :  { %v1158_v52 = vsel %vm184_vm2, %v3407_v50, 0.0  ;;  %v2779_v53 = vpop.f32.mrb[23].mxu0 }
 0xff4   :  { %1159 = vadd.xlane.f32.xlu1 %v1158_v52 }
0x1071   :  { %v1154_v54 = vpop.xlane.xlu1 %1153 }
0x1072   :  { %v1161_v55 = vmul.f32 0.03125, %v1154_v54  ;;  %v3457_v54 = vld [vmem:[%s3736_s3] sm:$0xff] }
0x1073   :  { %vm1147_vm11 = vcmp.gt.s32.totalorder %v3457_v54, 0 }
0x1074   :  { %v1164_v56 = vsub.f32 %v3399_v44, %v1161_v55  ;;  %v3462_v55 = vld [vmem:[%s3736_s3 + $0x10] sm:$0xff] }
0x1075   :  { %vm1149_vm12 = vcmp.gt.s32.totalorder %v3462_v55, 0 }
0x1076   :  { %v1167_v57 = vmul.f32 %v1164_v56, %v1164_v56 }
0x1078   :  { %v1170_v58 = vsel %vm184_vm2, %v1167_v57, 0.0 }
0x1079   :  { %1171 = vadd.xlane.f32.xlu1 %v1170_v58 }
0x107f   :  { %v1157_v60 = vpop.xlane.xlu0 %1156 }
0x1080   :  { %v1162_v61 = vmul.f32 0.03125, %v1157_v60 }
0x1081   :  { %v1160_v62 = vpop.xlane.xlu1 %1159 }
0x1082   :  { %v1165_v63 = vsub.f32 %v3403_v34, %v1162_v61  ;;  %v1163_v0 = vmul.f32 0.03125, %v1160_v62 }
0x1084   :  { %v1166_v1 = vsub.f32 %v3407_v50, %v1163_v0  ;;  %v1168_v2 = vmul.f32 %v1165_v63, %v1165_v63 }
0x1086   :  { %v1173_v59 = vsel %vm184_vm2, %v1168_v2, 0.0  ;;  %v1169_v3 = vmul.f32 %v1166_v1, %v1166_v1 }
0x1087   :  { %1174 = vadd.xlane.f32.xlu1 %v1173_v59 }
0x1088   :  { %v1176_v4 = vsel %vm184_vm2, %v1169_v3, 0.0 }
0x108b   :  { %1177 = vadd.xlane.f32.xlu1 %v1176_v4 }
0x1106   :  { %v1172_v7 = vpop.xlane.xlu1 %1171 }
0x1107   :  { %v1179_v8 = vmul.f32 0.03125, %v1172_v7 }
0x1109   :  { %v1182_v9 = vadd.f32 1e-05, %v1179_v8 }
0x110b   :  { %2996 = vrsqrt.f32 %v1182_v9 }
0x1114   :  { %v1175_v10 = vpop.xlane.xlu1 %1174 }
0x1115   :  { %v1180_v11 = vmul.f32 0.03125, %v1175_v10  ;;  %v2997_v16 = vpop.eup %2996 }
0x1116   :  { %v1188_v17 = vmul.f32 %v2997_v16, %v1164_v56  ;;  %v3467_v56 = vld [vmem:[%s3736_s3 + $0x8] sm:$0xff] }
0x1117   :  { %v1183_v12 = vadd.f32 1e-05, %v1180_v11  ;;  %vm1148_vm13 = vcmp.gt.s32.totalorder %v3467_v56, 0 }
0x1118   :  { %v1178_v13 = vpop.xlane.xlu1 %1177  ;;  %v1195_v21 = vmul.f32 %v2535_v18, %v1188_v17 }
0x1119   :  { %2998 = vrsqrt.f32 %v1183_v12  ;;  %v1181_v15 = vmul.f32 0.03125, %v1178_v13 }
0x111a   :  { %v1202_v27 = vadd.f32 %v2536_v22, %v1195_v21 }
0x111b   :  { %v1184_v51 = vadd.f32 1e-05, %v1181_v15 }
0x111d   :  { %3000 = vrsqrt.f32 %v1184_v51 }
0x1123   :  { %v2999_v19 = vpop.eup %2998 }
0x1124   :  { %v1189_v20 = vmul.f32 %v2999_v19, %v1165_v63 }
0x1126   :  { %v1196_v23 = vmul.f32 %v2535_v18, %v1189_v20 }
0x1127   :  { %v3001_v24 = vpop.eup %3000 }
0x1128   :  { %v1190_v26 = vmul.f32 %v3001_v24, %v1166_v1  ;;  %v1203_v28 = vadd.f32 %v2536_v22, %v1196_v23 }
0x112a   :  { %v1205_v29 = vpack.c.bf16 %v1203_v28, %v1202_v27  ;;  %v1197_v30 = vmul.f32 %v2535_v18, %v1190_v26 }
0x112c   :  { %2784 = vmatprep.mubr.msk.bf16.mxu1 %vm184_vm2, %v1205_v29  ;;  %v1204_v31 = vadd.f32 %v2536_v22, %v1197_v30 }
0x112e   :  { %v1206_v32 = vpack.c.bf16 %v1204_v31, %v1204_v31 }
0x1130   :  { %2785 = vmatmul.mubr.msk.bf16.vlgmr.msra.gmra.mrb[36].mxu1 %vm184_vm2, %v1206_v32 }
0x1203   :  { %v2786_v35 = vpop.f32.mrb[36].mxu1 }
0x1204   :  { %v1277_v36 = vadd.f32 %v2786_v35, %v2537_v33  ;;  %v1268_v37 = vpop.f32.mrb[37].mxu1 }
0x1205   :  { %v1269_v38 = vadd.f32 %v2537_v33, %v1268_v37  ;;  %v2787_v39 = vpop.f32.mrb[38].mxu1 }
0x1206   :  { %v3434_v40 = vpack.c.bf16 %v1277_v36, %v1277_v36  ;;  %v1271_v41 = vpop.f32.mrb[39].mxu1  ;;  %v1284_v52 = vmul.f32 0.35355338, %v1277_v36 }
0x1207   :  { %v1272_v14 = vadd.f32 %v2537_v33, %v1271_v41  ;;  %v1282_v42 = vmul.f32 0.35355338, %v1269_v38 }
0x1208   :  { %1293 = vrot.lane.b32.xlu0 %v3434_v40, %s3072_s15  ;;  %v3450_v53 = vpack.c.bf16 %v1284_v52, %v1284_v52 }
0x1209   :  { %v1283_v43 = vmul.f32 0.35355338, %v1272_v14  ;;  %v3438_v45 = vpack.c.bf16 %v1272_v14, %v1269_v38 }
0x120b   :  { %v3440_v46 = vpack.c.bf16 %v1283_v43, %v1282_v42  ;;  %1291 = vrot.lane.b32.xlu1 %v3438_v45, %s3072_s15 }
0x120d   :  { %2792 = vmatprep.mubr.msk.bf16.mxu1 %vm280_vm4, %v3440_v46 }
0x127a   :  { %v1294_v49 = vpop.permute.xlu0 %1293 }
0x127b   :  { %v1305_v25 = vsel %vm280_vm4, %v1294_v49, 0 }
0x127d   :  { %v1292_v47 = vpop.permute.xlu1 %1291 }
0x127e   :  { %v1302_v48 = vsel %vm280_vm4, %v1292_v47, 0  ;;  %2888 = vmatprep.subr.msk.bf16.mxu1 %vm280_vm4, %v1292_v47 }
0x127f   :  { %2789 = vmatpush3.bf16.xpose.msra.mxu1 %v1302_v48 }
0x1280   :  { %2889 = vmatprep.subr.msk.bf16.mxu1 %vm280_vm4, %v1294_v49 }
0x1287   :  { %2791 = vmatpush3.bf16.xpose.msra.mxu1 %v1305_v25 }
0x128e   :  { %2793 = vmatmul.mubr.msk.bf16.vlgmr.msra.gmra.mrb[40].mxu1 %vm280_vm4, %v3450_v53 }
0x1361   :  { %v2794_v57 = vpop.f32.mrb[40].mxu1 }
0x1362   :  { %v1341_v58 = vpop.f32.mrb[41].mxu1  ;;  %v1357_v0 = vsel %vm1149_vm12, %v2794_v57, -1e+30 }
0x1363   :  { %v1355_v60 = vsel %vm1147_vm11, %v1341_v58, -1e+30  ;;  %v2795_v61 = vpop.f32.mrb[42].mxu1  ;;  %v1364_v59 = vsel %vm737_vm7, %v1357_v0, -inf }
0x1364   :  { %v1344_v62 = vpop.f32.mrb[43].mxu1  ;;  %v1358_v63 = vsel %vm737_vm7, %v1355_v60, -inf }
0x1365   :  { %v1356_v1 = vsel %vm1148_vm13, %v1344_v62, -1e+30  ;;  %1359 = vmax.xlane.f32.xlu1 %v1358_v63 }
0x1366   :  { %v1361_v2 = vsel %vm737_vm7, %v1356_v1, -inf }
0x1367   :  { %1362 = vmax.xlane.f32.xlu0 %v1361_v2 }
0x1369   :  { %1365 = vmax.xlane.f32.xlu1 %v1364_v59 }
0x137a   :  { %1393 = vrot.lane.b32.xlu1 %v3438_v45, %s3071_s14 }
0x13f2   :  { %v1360_v3 = vpop.xlane.xlu1 %1359 }
0x13f3   :  { %v1367_v5 = vsub.f32 %v1355_v60, %v1360_v3 }
0x13f4   :  { %v1363_v4 = vpop.xlane.xlu0 %1362 }
0x13f5   :  { %v1368_v6 = vsub.f32 %v1356_v1, %v1363_v4  ;;  %v1370_v10 = vmul.f32 1.442695, %v1367_v5 }
0x13f6   :  { %v1366_v7 = vpop.xlane.xlu1 %1365 }
0x13f7   :  { %v1372_v8 = vmul.f32 1.442695, %v1368_v6  ;;  %v1369_v9 = vsub.f32 %v1357_v0, %v1366_v7 }
0x13f9   :  { %3002 = vpow2.f32 %v1372_v8  ;;  %v1374_v11 = vmul.f32 1.442695, %v1369_v9 }
0x13fa   :  { %v1394_v12 = vpop.permute.xlu1 %1393 }
0x13fb   :  { %3004 = vpow2.f32 %v1374_v11  ;;  %2796 = vmatprep.subr.bf16.mxu0 %v1394_v12 }
0x13fc   :  { %2797 = vmatpush3.bf16.msra.mxu0 %v1394_v12  ;;  %3006 = vpow2.f32 %v1370_v10 }
0x1403   :  { %v3003_v13 = vpop.eup %3002 }
0x1404   :  { %v1379_v15 = vsel %vm737_vm7, %v3003_v13, 0.0 }
0x1405   :  { %v3005_v51 = vpop.eup %3004  ;;  %1380 = vadd.xlane.f32.xlu1 %v1379_v15 }
0x1406   :  { %v1382_v16 = vsel %vm737_vm7, %v3005_v51, 0.0  ;;  %v3007_v17 = vpop.eup %3006 }
0x1407   :  { %1383 = vadd.xlane.f32.xlu0 %v1382_v16  ;;  %v1376_v18 = vsel %vm737_vm7, %v3007_v17, 0.0 }
0x140b   :  { %1377 = vadd.xlane.f32.xlu0 %v1376_v18 }
0x1416   :  { %1461 = vrot.lane.b32.xlu1 %v3438_v45, %s3073_s2 }
0x141a   :  { %1463 = vrot.lane.b32.xlu1 %v3434_v40, %s3073_s2 }
0x141e   :  { %1459 = vrot.lane.b32.xlu1 %v3450_v53, %s3074_s18 }
0x1421   :  { %1395 = vrot.lane.b32.xlu0 %v3434_v40, %s3071_s14 }
0x1425   :  { %1457 = vrot.lane.b32.xlu0 %v3440_v46, %s3074_s18 }
0x1492   :  { %v1381_v19 = vpop.xlane.xlu1 %1380 }
0x1494   :  { %v1384_v20 = vpop.xlane.xlu0 %1383 }
0x1495   :  { %3008 = vrcp.f32 %v1384_v20 }
0x1496   :  { %3010 = vrcp.f32 %v1381_v19  ;;  %v1462_v24 = vpop.permute.xlu1 %1461 }
0x1497   :  { %v1472_v35 = vsel %vm280_vm4, %v1462_v24, 0 }
0x1498   :  { %v1378_v21 = vpop.xlane.xlu0 %1377 }
0x1499   :  { %3012 = vrcp.f32 %v1378_v21 }
0x149a   :  { %v1464_v37 = vpop.permute.xlu1 %1463 }
0x149b   :  { %v1475_v38 = vsel %vm280_vm4, %v1464_v37, 0 }
0x149c   :  { %v1396_v22 = vpop.permute.xlu0 %1395 }
0x149d   :  { %v1405_v23 = vsel %vm177_vm1, %v1396_v22, 0  ;;  %2890 = vmatprep.subr.msk.bf16.mxu0 %vm177_vm1, %v1396_v22 }
0x149e   :  { %2799 = vmatpush3.bf16.msra.mxu0 %v1405_v23  ;;  %v1460_v39 = vpop.permute.xlu1 %1459 }
0x149f   :  { %2891 = vmatprep.subr.msk.bf16.mxu0 %vm280_vm4, %v1462_v24  ;;  %v3009_v26 = vpop.eup %3008 }
0x14a0   :  { %v3011_v27 = vpop.eup %3010  ;;  %v1390_v29 = vmul.f32 %v3009_v26, %v3005_v51  ;;  %v1458_v36 = vpop.permute.xlu0 %1457 }
0x14a1   :  { %v1389_v31 = vmul.f32 %v3011_v27, %v3003_v13 }
0x14a2   :  { %v1392_v33 = vpack.c.bf16 %v1390_v29, %v1390_v29 }
0x14a3   :  { %v3013_v28 = vpop.eup %3012 }
0x14a4   :  { %v1388_v30 = vmul.f32 %v3013_v28, %v3007_v17 }
0x14a6   :  { %v1391_v32 = vpack.c.bf16 %v1389_v31, %v1388_v30 }
0x14a8   :  { %2800 = vmatprep.mubr.msk.bf16.mxu0 %vm737_vm7, %v1391_v32 }
0x14a9   :  { %2801 = vmatmul.mubr.msk.bf16.vlgmr.msra.gmra.mrb[24].mxu0 %vm737_vm7, %v1392_v33 }
0x14aa   :  { %2805 = vmatpush3.bf16.xpose.msra.mxu0 %v1472_v35  ;;  %2808 = vmatprep.mubr.msk.bf16.mxu0 %vm280_vm4, %v1458_v36 }
0x14ab   :  { %2892 = vmatprep.subr.msk.bf16.mxu0 %vm280_vm4, %v1464_v37 }
0x14b2   :  { %2807 = vmatpush3.bf16.xpose.msra.mxu0 %v1475_v38 }
0x14b9   :  { %2809 = vmatmul.mubr.msk.bf16.vlgmr.msra.gmra.mrb[28].mxu0 %vm280_vm4, %v1460_v39 }
0x157c   :  { %v3506_v41 = vpop.f32.mrb[24].mxu0 }
0x157d   :  { %v3508_v14 = vpop.f32.mrb[25].mxu0 }
0x157e   :  { %v2803_v42 = vpop.f32.mrb[26].mxu0 }
0x157f   :  { %v3510_v43 = vpop.f32.mrb[27].mxu0 }
0x158c   :  { %v2810_v47 = vpop.f32.mrb[28].mxu0 }
0x158d   :  { %v1511_v48 = vpop.f32.mrb[29].mxu0  ;;  %v1527_v58 = vsel %vm1149_vm12, %v2810_v47, -1e+30 }
0x158e   :  { %v1525_v49 = vsel %vm1147_vm11, %v1511_v48, -1e+30  ;;  %v2811_v25 = vpop.f32.mrb[30].mxu0  ;;  %v1534_v62 = vsel %vm737_vm7, %v1527_v58, -inf }
0x158f   :  { %v1514_v52 = vpop.f32.mrb[31].mxu0  ;;  %v1528_v57 = vsel %vm737_vm7, %v1525_v49, -inf }
0x1590   :  { %v1526_v60 = vsel %vm1148_vm13, %v1514_v52, -1e+30  ;;  %1529 = vmax.xlane.f32.xlu0 %v1528_v57 }
0x1591   :  { %v1531_v61 = vsel %vm737_vm7, %v1526_v60, -inf }
0x1592   :  { %1532 = vmax.xlane.f32.xlu1 %v1531_v61 }
0x1594   :  { %1535 = vmax.xlane.f32.xlu0 %v1534_v62 }
0x15a3   :  { %1563 = vrot.lane.b32.xlu1 %v3438_v45, %s3075_s19 }
0x161d   :  { %v1530_v63 = vpop.xlane.xlu0 %1529 }
0x161e   :  { %v1537_v1 = vsub.f32 %v1525_v49, %v1530_v63 }
0x161f   :  { %v1533_v0 = vpop.xlane.xlu1 %1532 }
0x1620   :  { %v1538_v2 = vsub.f32 %v1526_v60, %v1533_v0  ;;  %v1540_v6 = vmul.f32 1.442695, %v1537_v1 }
0x1621   :  { %v1536_v59 = vpop.xlane.xlu0 %1535 }
0x1622   :  { %v1542_v3 = vmul.f32 1.442695, %v1538_v2  ;;  %v1539_v4 = vsub.f32 %v1527_v58, %v1536_v59 }
0x1623   :  { %v1564_v5 = vpop.permute.xlu1 %1563 }
0x1624   :  { %3014 = vpow2.f32 %v1542_v3  ;;  %v1544_v7 = vmul.f32 1.442695, %v1539_v4  ;;  %2812 = vmatprep.subr.bf16.mxu1 %v1564_v5 }
0x1625   :  { %2813 = vmatpush3.bf16.msra.mxu1 %v1564_v5 }
0x1626   :  { %3016 = vpow2.f32 %v1544_v7 }
0x1627   :  { %3018 = vpow2.f32 %v1540_v6 }
0x162e   :  { %v3015_v8 = vpop.eup %3014 }
0x162f   :  { %v1549_v9 = vsel %vm737_vm7, %v3015_v8, 0.0 }
0x1630   :  { %v3017_v10 = vpop.eup %3016  ;;  %1550 = vadd.xlane.f32.xlu1 %v1549_v9 }
0x1631   :  { %v1552_v11 = vsel %vm737_vm7, %v3017_v10, 0.0  ;;  %v3019_v12 = vpop.eup %3018 }
0x1632   :  { %1553 = vadd.xlane.f32.xlu0 %v1552_v11  ;;  %v1546_v13 = vsel %vm737_vm7, %v3019_v12, 0.0 }
0x1636   :  { %1547 = vadd.xlane.f32.xlu0 %v1546_v13 }
0x1641   :  { %1629 = vrot.lane.b32.xlu1 %v3438_v45, %s3076_s20 }
0x1645   :  { %1631 = vrot.lane.b32.xlu1 %v3434_v40, %s3076_s20 }
0x1649   :  { %1627 = vrot.lane.b32.xlu1 %v3450_v53, %s3077_s21 }
0x164c   :  { %1565 = vrot.lane.b32.xlu0 %v3434_v40, %s3075_s19 }
0x1650   :  { %1625 = vrot.lane.b32.xlu0 %v3440_v46, %s3077_s21 }
0x16bd   :  { %v1551_v15 = vpop.xlane.xlu1 %1550 }
0x16bf   :  { %v1554_v51 = vpop.xlane.xlu0 %1553 }
0x16c0   :  { %3020 = vrcp.f32 %v1554_v51 }
0x16c1   :  { %3022 = vrcp.f32 %v1551_v15  ;;  %v1630_v19 = vpop.permute.xlu1 %1629 }
0x16c2   :  { %v1640_v29 = vsel %vm280_vm4, %v1630_v19, 0 }
0x16c3   :  { %v1548_v16 = vpop.xlane.xlu0 %1547 }
0x16c4   :  { %3024 = vrcp.f32 %v1548_v16 }
0x16c5   :  { %v1632_v31 = vpop.permute.xlu1 %1631 }
0x16c6   :  { %v1643_v32 = vsel %vm280_vm4, %v1632_v31, 0 }
0x16c7   :  { %v1566_v17 = vpop.permute.xlu0 %1565 }
0x16c8   :  { %v1575_v18 = vsel %vm177_vm1, %v1566_v17, 0  ;;  %2893 = vmatprep.subr.msk.bf16.mxu1 %vm177_vm1, %v1566_v17 }
0x16c9   :  { %2815 = vmatpush3.bf16.msra.mxu1 %v1575_v18  ;;  %v1628_v33 = vpop.permute.xlu1 %1627 }
0x16ca   :  { %2894 = vmatprep.subr.msk.bf16.mxu1 %vm280_vm4, %v1630_v19  ;;  %v3021_v20 = vpop.eup %3020 }
0x16cb   :  { %v3023_v21 = vpop.eup %3022  ;;  %v1560_v23 = vmul.f32 %v3021_v20, %v3017_v10  ;;  %v1626_v30 = vpop.permute.xlu0 %1625 }
0x16cc   :  { %v1559_v26 = vmul.f32 %v3023_v21, %v3015_v8 }
0x16cd   :  { %v1562_v28 = vpack.c.bf16 %v1560_v23, %v1560_v23 }
0x16ce   :  { %v3025_v22 = vpop.eup %3024 }
0x16cf   :  { %v1558_v24 = vmul.f32 %v3025_v22, %v3019_v12 }
0x16d1   :  { %v1561_v27 = vpack.c.bf16 %v1559_v26, %v1558_v24 }
0x16d3   :  { %2816 = vmatprep.mubr.msk.bf16.mxu1 %vm737_vm7, %v1561_v27 }
0x16d4   :  { %2817 = vmatmul.mubr.msk.bf16.vlgmr.msra.gmra.mrb[44].mxu1 %vm737_vm7, %v1562_v28 }
0x16d5   :  { %2821 = vmatpush3.bf16.xpose.msra.mxu1 %v1640_v29  ;;  %2824 = vmatprep.mubr.msk.bf16.mxu1 %vm280_vm4, %v1626_v30 }
0x16d6   :  { %2895 = vmatprep.subr.msk.bf16.mxu1 %vm280_vm4, %v1632_v31 }
0x16dd   :  { %2823 = vmatpush3.bf16.xpose.msra.mxu1 %v1643_v32 }
0x16e4   :  { %2825 = vmatmul.mubr.msk.bf16.vlgmr.msra.gmra.mrb[48].mxu1 %vm280_vm4, %v1628_v33 }
0x17a7   :  { %v3546_v35 = vpop.f32.mrb[44].mxu1 }
0x17a8   :  { %v3548_v36 = vpop.f32.mrb[45].mxu1 }
0x17a9   :  { %v2819_v37 = vpop.f32.mrb[46].mxu1 }
0x17aa   :  { %v3550_v38 = vpop.f32.mrb[47].mxu1 }
0x17ab   :  { %v2919_v39 = vpack.i.bf16 %v3550_v38, %v3548_v36 }
0x17b7   :  { %v2826_v42 = vpop.f32.mrb[48].mxu1 }
0x17b8   :  { %v1679_v47 = vpop.f32.mrb[49].mxu1  ;;  %v1695_v57 = vsel %vm1149_vm12, %v2826_v42, -1e+30 }
0x17b9   :  { %v1693_v48 = vsel %vm1147_vm11, %v1679_v47, -1e+30  ;;  %v2827_v49 = vpop.f32.mrb[50].mxu1  ;;  %v1702_v61 = vsel %vm737_vm7, %v1695_v57, -inf }
0x17ba   :  { %v1682_v25 = vpop.f32.mrb[51].mxu1  ;;  %v1696_v52 = vsel %vm737_vm7, %v1693_v48, -inf }
0x17bb   :  { %v1694_v58 = vsel %vm1148_vm13, %v1682_v25, -1e+30  ;;  %1697 = vmax.xlane.f32.xlu0 %v1696_v52 }
0x17bc   :  { %v1699_v60 = vsel %vm737_vm7, %v1694_v58, -inf }
0x17bd   :  { %1700 = vmax.xlane.f32.xlu1 %v1699_v60 }
0x17bf   :  { %1703 = vmax.xlane.f32.xlu0 %v1702_v61 }
0x17ce   :  { %1731 = vrot.lane.b32.xlu1 %v3438_v45, %s3081_s25 }
0x1848   :  { %v1698_v62 = vpop.xlane.xlu0 %1697 }
0x1849   :  { %v1705_v0 = vsub.f32 %v1693_v48, %v1698_v62 }
0x184a   :  { %v1701_v63 = vpop.xlane.xlu1 %1700 }
0x184b   :  { %v1706_v1 = vsub.f32 %v1694_v58, %v1701_v63  ;;  %v1708_v5 = vmul.f32 1.442695, %v1705_v0 }
0x184c   :  { %v1704_v2 = vpop.xlane.xlu0 %1703 }
0x184d   :  { %v1710_v59 = vmul.f32 1.442695, %v1706_v1  ;;  %v1707_v3 = vsub.f32 %v1695_v57, %v1704_v2 }
0x184e   :  { %v1732_v4 = vpop.permute.xlu1 %1731 }
0x184f   :  { %3026 = vpow2.f32 %v1710_v59  ;;  %v1712_v6 = vmul.f32 1.442695, %v1707_v3  ;;  %2828 = vmatprep.subr.bf16.mxu0 %v1732_v4 }
0x1850   :  { %2829 = vmatpush3.bf16.msra.mxu0 %v1732_v4 }
0x1851   :  { %3028 = vpow2.f32 %v1712_v6 }
0x1852   :  { %3030 = vpow2.f32 %v1708_v5 }
0x1859   :  { %v3027_v7 = vpop.eup %3026 }
0x185a   :  { %v1717_v8 = vsel %vm737_vm7, %v3027_v7, 0.0 }
0x185b   :  { %v3029_v9 = vpop.eup %3028  ;;  %1718 = vadd.xlane.f32.xlu1 %v1717_v8 }
0x185c   :  { %v1720_v10 = vsel %vm737_vm7, %v3029_v9, 0.0  ;;  %v3031_v11 = vpop.eup %3030 }
0x185d   :  { %1721 = vadd.xlane.f32.xlu0 %v1720_v10  ;;  %v1714_v12 = vsel %vm737_vm7, %v3031_v11, 0.0 }
0x1861   :  { %1715 = vadd.xlane.f32.xlu0 %v1714_v12 }
0x186c   :  { %1797 = vrot.lane.b32.xlu1 %v3438_v45, %s3078_s22 }
0x1870   :  { %1799 = vrot.lane.b32.xlu1 %v3434_v40, %s3078_s22 }
0x1874   :  { %1795 = vrot.lane.b32.xlu1 %v3450_v53, %s3079_s23 }
0x1877   :  { %1733 = vrot.lane.b32.xlu0 %v3434_v40, %s3081_s25 }
0x187b   :  { %1793 = vrot.lane.b32.xlu0 %v3440_v46, %s3079_s23 }
0x18e8   :  { %v1719_v13 = vpop.xlane.xlu1 %1718 }
0x18ea   :  { %v1722_v15 = vpop.xlane.xlu0 %1721 }
0x18eb   :  { %3032 = vrcp.f32 %v1722_v15 }
0x18ec   :  { %3034 = vrcp.f32 %v1719_v13  ;;  %v1798_v18 = vpop.permute.xlu1 %1797 }
0x18ed   :  { %v1808_v26 = vsel %vm280_vm4, %v1798_v18, 0 }
0x18ee   :  { %v1716_v51 = vpop.xlane.xlu0 %1715 }
0x18ef   :  { %3036 = vrcp.f32 %v1716_v51 }
0x18f0   :  { %v1800_v28 = vpop.permute.xlu1 %1799 }
0x18f1   :  { %v1811_v29 = vsel %vm280_vm4, %v1800_v28, 0 }
0x18f2   :  { %v1734_v16 = vpop.permute.xlu0 %1733 }
0x18f3   :  { %v1743_v17 = vsel %vm177_vm1, %v1734_v16, 0  ;;  %2896 = vmatprep.subr.msk.bf16.mxu0 %vm177_vm1, %v1734_v16 }
0x18f4   :  { %2831 = vmatpush3.bf16.msra.mxu0 %v1743_v17  ;;  %v1796_v30 = vpop.permute.xlu1 %1795 }
0x18f5   :  { %2897 = vmatprep.subr.msk.bf16.mxu0 %vm280_vm4, %v1798_v18  ;;  %v3033_v53 = vpop.eup %3032  ;;  %v2964_v18 = vld [vmem:[%s3731_s4 + $0xec] sm:$0xff]  }
0x18f6   :  { %v3035_v19 = vpop.eup %3034  ;;  %v1728_v21 = vmul.f32 %v3033_v53, %v3029_v9  ;;  %v1794_v27 = vpop.permute.xlu0 %1793  ;;  %v2965_v53 = vld [vmem:[%s3731_s4 + $0xf4] sm:$0xff]  }
0x18f7   :  { %v1727_v22 = vmul.f32 %v3035_v19, %v3027_v7 }
0x18f8   :  { %v1730_v24 = vpack.c.bf16 %v1728_v21, %v1728_v21 }
0x18f9   :  { %v3037_v20 = vpop.eup %3036 }
0x18fa   :  { %v1726_v46 = vmul.f32 %v3037_v20, %v3031_v11 }
0x18fc   :  { %v1729_v23 = vpack.c.bf16 %v1727_v22, %v1726_v46 }
0x18fe   :  { %2832 = vmatprep.mubr.msk.bf16.mxu0 %vm737_vm7, %v1729_v23 }
0x18ff   :  { %2833 = vmatmul.mubr.msk.bf16.vlgmr.msra.gmra.mrb[32].mxu0 %vm737_vm7, %v1730_v24 }
0x1900   :  { %2837 = vmatpush3.bf16.xpose.msra.mxu0 %v1808_v26  ;;  %2840 = vmatprep.mubr.msk.bf16.mxu0 %vm280_vm4, %v1794_v27 }
0x1901   :  { %2898 = vmatprep.subr.msk.bf16.mxu0 %vm280_vm4, %v1800_v28 }
0x1908   :  { %2839 = vmatpush3.bf16.xpose.msra.mxu0 %v1811_v29 }
0x190f   :  { %2841 = vmatmul.mubr.msk.bf16.vlgmr.msra.gmra.mrb[36].mxu0 %vm280_vm4, %v1796_v30 }
0x19d2   :  { %v2834_v31 = vpop.f32.mrb[32].mxu0 }
0x19d3   :  { %v1779_v32 = vpop.f32.mrb[33].mxu0 }
0x19d4   :  { %v2835_v33 = vpop.f32.mrb[34].mxu0 }
0x19d5   :  { %v1782_v37 = vpop.f32.mrb[35].mxu0 }
0x19d6   :  { %v2924_v42 = vpack.i.bf16 %v1782_v37, %v1779_v32 }
0x19e2   :  { %v2842_v47 = vpop.f32.mrb[36].mxu0 }
0x19e3   :  { %v1847_v48 = vpop.f32.mrb[37].mxu0  ;;  %v1863_v58 = vsel %vm1149_vm12, %v2842_v47, -1e+30 }
0x19e4   :  { %v1861_v49 = vsel %vm1147_vm11, %v1847_v48, -1e+30  ;;  %v2843_v25 = vpop.f32.mrb[38].mxu0  ;;  %v1870_v62 = vsel %vm737_vm7, %v1863_v58, -inf }
0x19e5   :  { %v1850_v52 = vpop.f32.mrb[39].mxu0  ;;  %v1864_v57 = vsel %vm737_vm7, %v1861_v49, -inf }
0x19e6   :  { %v1862_v60 = vsel %vm1148_vm13, %v1850_v52, -1e+30  ;;  %1865 = vmax.xlane.f32.xlu0 %v1864_v57 }
0x19e7   :  { %v1867_v61 = vsel %vm737_vm7, %v1862_v60, -inf }
0x19e8   :  { %1868 = vmax.xlane.f32.xlu1 %v1867_v61 }
0x19ea   :  { %1871 = vmax.xlane.f32.xlu0 %v1870_v62 }
0x1a73   :  { %v1866_v63 = vpop.xlane.xlu0 %1865 }
0x1a74   :  { %v1873_v0 = vsub.f32 %v1861_v49, %v1866_v63 }
0x1a75   :  { %v1869_v54 = vpop.xlane.xlu1 %1868 }
0x1a76   :  { %v1874_v1 = vsub.f32 %v1862_v60, %v1869_v54  ;;  %v1876_v4 = vmul.f32 1.442695, %v1873_v0 }
0x1a77   :  { %v1872_v2 = vpop.xlane.xlu0 %1871 }
0x1a78   :  { %v1878_v59 = vmul.f32 1.442695, %v1874_v1  ;;  %v1875_v3 = vsub.f32 %v1863_v58, %v1872_v2 }
0x1a7a   :  { %3038 = vpow2.f32 %v1878_v59  ;;  %v1880_v55 = vmul.f32 1.442695, %v1875_v3 }
0x1a7c   :  { %3040 = vpow2.f32 %v1880_v55 }
0x1a7d   :  { %3042 = vpow2.f32 %v1876_v4 }
0x1a84   :  { %v3039_v56 = vpop.eup %3038 }
0x1a85   :  { %v1885_v5 = vsel %vm737_vm7, %v3039_v56, 0.0 }
0x1a86   :  { %v3041_v6 = vpop.eup %3040  ;;  %1886 = vadd.xlane.f32.xlu1 %v1885_v5 }
0x1a87   :  { %v1888_v7 = vsel %vm737_vm7, %v3041_v6, 0.0  ;;  %v3043_v8 = vpop.eup %3042 }
0x1a88   :  { %1889 = vadd.xlane.f32.xlu0 %v1888_v7  ;;  %v1882_v9 = vsel %vm737_vm7, %v3043_v8, 0.0 }
0x1a8c   :  { %1883 = vadd.xlane.f32.xlu0 %v1882_v9 }
0x1a97   :  { %1899 = vrot.lane.b32.xlu1 %v3438_v45, %s3080_s24 }
0x1a9b   :  { %2920 = vrot.lane.b32.xlu1 %v2919_v39, %s3082_s26 }
0x1a9f   :  { %1968 = vrot.lane.b32.xlu1 %v3546_v35, %s3082_s26 }
0x1aa2   :  { %1901 = vrot.lane.b32.xlu0 %v3434_v40, %s3080_s24 }
0x1aa3   :  { %1980 = vrot.lane.b32.xlu1 %v2834_v31, %s3083_s30 }
0x1aa6   :  { %2925 = vrot.lane.b32.xlu0 %v2924_v42, %s3083_s30 }
0x1b13   :  { %v1887_v10 = vpop.xlane.xlu1 %1886 }
0x1b15   :  { %v1890_v11 = vpop.xlane.xlu0 %1889 }
0x1b16   :  { %3044 = vrcp.f32 %v1890_v11 }
0x1b17   :  { %v1900_v12 = vpop.permute.xlu1 %1899  ;;  %3046 = vrcp.f32 %v1887_v10 }
0x1b18   :  { %2844 = vmatprep.subr.bf16.mxu1 %v1900_v12 }
0x1b19   :  { %v1884_v45 = vpop.xlane.xlu0 %1883  ;;  %2845 = vmatpush3.bf16.msra.mxu1 %v1900_v12 }
0x1b1a   :  { %3048 = vrcp.f32 %v1884_v45 }
0x1b1b   :  { %v2921_v23 = vpop.permute.xlu1 %2920 }
0x1b1c   :  { %v2923_v28 = vunpack.i.h.bf16 %v2921_v23  ;;  %v2922_v29 = vunpack.i.l.bf16 %v2921_v23  ;;  %v2563_v23 = vld [vmem:[%s3733_s5 + $0x11] ss:$0 sm:$0xff] }
0x1b1d   :  { %v1902_v36 = vpop.permute.xlu0 %1901 }
0x1b1e   :  { %v1911_v38 = vsel %vm177_vm1, %v1902_v36, 0  ;;  %2899 = vmatprep.subr.msk.bf16.mxu1 %vm177_vm1, %v1902_v36  ;;  %v1998_v33 = vsel %vm280_vm4, %v3510_v43, %v2923_v28  ;;  %v1997_v47 = vsel %vm280_vm4, %v3508_v14, %v2922_v29  ;;  %v2558_v14 = vld [vmem:[%s3733_s5 + $0x10] ss:$0 sm:$0xff] }
0x1b1f   :  { %2847 = vmatpush3.bf16.msra.mxu1 %v1911_v38  ;;  %v1969_v24 = vpop.permute.xlu1 %1968 }
0x1b20   :  { %v3045_v40 = vpop.eup %3044  ;;  %2852 = vmatprep.subr.bf16.mxu1 %v2964_v18  ;;  %v1999_v37 = vsel %vm280_vm4, %v3506_v41, %v1969_v24 }
0x1b21   :  { %v3047_v35 = vpop.eup %3046  ;;  %v1896_v13 = vmul.f32 %v3045_v40, %v3041_v6  ;;  %v2926_v26 = vpop.permute.xlu0 %2925 }
0x1b22   :  { %v1895_v51 = vmul.f32 %v3047_v35, %v3039_v56  ;;  %v2928_v30 = vunpack.i.h.bf16 %v2926_v26  ;;  %v2927_v31 = vunpack.i.l.bf16 %v2926_v26 }
0x1b23   :  { %v1898_v17 = vpack.c.bf16 %v1896_v13, %v1896_v13  ;;  %v1981_v27 = vpop.permute.xlu1 %1980  ;;  %v2966_v13 = vld [vmem:[%s3731_s4 + $0xfc] sm:$0xff]  }
0x1b24   :  { %v3049_v39 = vpop.eup %3048  ;;  %v2002_v48 = vsel %vm735_vm6, %v1999_v37, %v1981_v27  ;;  %v2000_v52 = vsel %vm735_vm6, %v1997_v47, %v2927_v31  ;;  %v2001_v57 = vsel %vm735_vm6, %v1998_v33, %v2928_v30  ;;  %2860 = vmatprep.subr.bf16.mxu0 %v2966_v13  ;;  %v2564_v30 = vld [vmem:[%s3733_s5 + $0x12] ss:$0 sm:$0xff] }
0x1b25   :  { %v1894_v15 = vmul.f32 %v3049_v39, %v3043_v8  ;;  %2861 = vmatpush3.bf16.msra.mxu0 %v2966_v13 }
0x1b27   :  { %v1897_v16 = vpack.c.bf16 %v1895_v51, %v1894_v15  ;;  %v2967_v15 = vld [vmem:[%s3731_s4 + $0x104] sm:$0xff]  }
0x1b28   :  { %2862 = vmatprep.subr.bf16.mxu0 %v2967_v15 }
0x1b29   :  { %2848 = vmatprep.mubr.msk.bf16.mxu1 %vm737_vm7, %v1897_v16  ;;  %2863 = vmatpush3.bf16.msra.mxu0 %v2967_v15 }
0x1b2a   :  { %2849 = vmatmul.mubr.msk.bf16.vlgmr.msra.gmra.mrb[52].mxu1 %vm737_vm7, %v1898_v17 }
0x1b2b   :  { %2853 = vmatpush3.bf16.msra.mxu1 %v2964_v18 }
0x1b2c   :  { %2854 = vmatprep.subr.bf16.mxu1 %v2965_v53 }
0x1b2f   :  { %2855 = vmatpush3.bf16.msra.mxu1 %v2965_v53 }
0x1bfd   :  { %v2850_v19 = vpop.f32.mrb[52].mxu1 }
0x1bfe   :  { %1992 = vrot.lane.b32.xlu1 %v2850_v19, %s3084_s7  ;;  %v1947_v20 = vpop.f32.mrb[53].mxu1 }
0x1bff   :  { %v2851_v21 = vpop.f32.mrb[54].mxu1 }
0x1c00   :  { %v1950_v46 = vpop.f32.mrb[55].mxu1 }
0x1c01   :  { %v2929_v22 = vpack.i.bf16 %v1950_v46, %v1947_v20 }
0x1c03   :  { %2930 = vrot.lane.b32.xlu0 %v2929_v22, %s3084_s7 }
0x1c70   :  { %v1993_v32 = vpop.permute.xlu1 %1992 }
0x1c71   :  { %v2005_v58 = vsel %vm737_vm7, %v2002_v48, %v1993_v32 }
0x1c72   :  { %v2007_v41 = vpack.c.bf16 %v2005_v58, %v2005_v58  ;;  %v2971_v58 = vld [vmem:[%s3731_s4 + $0x124] sm:$0xff]  }
0x1c75   :  { %v2931_v42 = vpop.permute.xlu0 %2930 }
0x1c76   :  { %v2933_v49 = vunpack.i.h.bf16 %v2931_v42  ;;  %v2932_v25 = vunpack.i.l.bf16 %v2931_v42 }
0x1c78   :  { %v2003_v60 = vsel %vm737_vm7, %v2000_v52, %v2932_v25  ;;  %v2004_v43 = vsel %vm737_vm7, %v2001_v57, %v2933_v49  ;;  %v2968_v25 = vld [vmem:[%s3731_s4 + $0x10c] sm:$0xff]   ;;  %v2969_v52 = vld [vmem:[%s3731_s4 + $0x114] sm:$0xff]   ;;  %v2970_v57 = vld [vmem:[%s3731_s4 + $0x11c] sm:$0xff]  }
0x1c79   :  { %v2006_v61 = vpack.c.bf16 %v2004_v43, %v2003_v60  ;;  %2868 = vmatprep.subr.bf16.mxu1 %v2968_v25  ;;  %v2565_v60 = vld [vmem:[%s3733_s5 + $0x13] ss:$0 sm:$0xff] }
0x1c7b   :  { %2856 = vmatprep.mubr.msk.bf16.mxu1 %vm184_vm2, %v2006_v61 }
0x1c7c   :  { %2857 = vmatmul.mubr.msk.bf16.vlgmr.msra.gmra.mrb[56].mxu1 %vm184_vm2, %v2007_v41 }
0x1c7d   :  { %2869 = vmatpush3.bf16.msra.mxu1 %v2968_v25 }
0x1c7e   :  { %2870 = vmatprep.subr.bf16.mxu1 %v2969_v52 }
0x1c81   :  { %2871 = vmatpush3.bf16.msra.mxu1 %v2969_v52 }
0x1c82   :  { %2872 = vmatprep.subr.bf16.mxu1 %v2970_v57 }
0x1c85   :  { %2873 = vmatpush3.bf16.msra.mxu1 %v2970_v57 }
0x1c86   :  { %2874 = vmatprep.subr.bf16.mxu1 %v2971_v58 }
0x1c89   :  { %2875 = vmatpush3.bf16.msra.mxu1 %v2971_v58 }
0x1d4f   :  { %v2858_v62 = vpop.f32.mrb[56].mxu1 }
0x1d50   :  { %v2078_v63 = vadd.f32 %v2858_v62, %v2558_v14  ;;  %v2069_v54 = vpop.f32.mrb[57].mxu1 }
0x1d51   :  { %v2070_v0 = vadd.f32 %v2558_v14, %v2069_v54  ;;  %v2859_v1 = vpop.f32.mrb[58].mxu1 }
0x1d52   :  { %v3642_v2 = vadd.f32 %v2078_v63, %v3407_v50  ;;  %v2072_v59 = vpop.f32.mrb[59].mxu1 }
0x1d53   :  { %v3645_v3 = vadd.f32 %v2070_v0, %v3399_v44  ;;  %v2073_v4 = vadd.f32 %v2558_v14, %v2072_v59 }
0x1d54   :  { %v2094_v50 = vsel %vm184_vm2, %v3642_v2, 0.0 }
0x1d55   :  { %v3648_v55 = vadd.f32 %v2073_v4, %v3403_v34  ;;  %v2088_v56 = vsel %vm184_vm2, %v3645_v3, 0.0 }
0x1d56   :  { %2089 = vadd.xlane.f32.xlu0 %v2088_v56 }
0x1d57   :  { %v2091_v5 = vsel %vm184_vm2, %v3648_v55, 0.0 }
0x1d58   :  { %2092 = vadd.xlane.f32.xlu1 %v2091_v5 }
0x1d5a   :  { %2095 = vadd.xlane.f32.xlu0 %v2094_v50 }
0x1de3   :  { %v2090_v6 = vpop.xlane.xlu0 %2089 }
0x1de4   :  { %v2097_v7 = vmul.f32 0.03125, %v2090_v6 }
0x1de5   :  { %v2093_v44 = vpop.xlane.xlu1 %2092 }
0x1de6   :  { %v2100_v8 = vsub.f32 %v3645_v3, %v2097_v7  ;;  %v2098_v9 = vmul.f32 0.03125, %v2093_v44 }
0x1de7   :  { %v2096_v34 = vpop.xlane.xlu0 %2095 }
0x1de8   :  { %v2101_v10 = vsub.f32 %v3648_v55, %v2098_v9  ;;  %v2099_v11 = vmul.f32 0.03125, %v2096_v34  ;;  %v2103_v12 = vmul.f32 %v2100_v8, %v2100_v8 }
0x1dea   :  { %v2102_v45 = vsub.f32 %v3642_v2, %v2099_v11  ;;  %v2106_v36 = vsel %vm184_vm2, %v2103_v12, 0.0  ;;  %v2104_v38 = vmul.f32 %v2101_v10, %v2101_v10 }
0x1deb   :  { %2107 = vadd.xlane.f32.xlu0 %v2106_v36 }
0x1dec   :  { %v2109_v40 = vsel %vm184_vm2, %v2104_v38, 0.0  ;;  %v2105_v35 = vmul.f32 %v2102_v45, %v2102_v45 }
0x1ded   :  { %2110 = vadd.xlane.f32.xlu1 %v2109_v40 }
0x1dee   :  { %v2112_v39 = vsel %vm184_vm2, %v2105_v35, 0.0 }
0x1def   :  { %2113 = vadd.xlane.f32.xlu0 %v2112_v39 }
0x1e78   :  { %v2108_v51 = vpop.xlane.xlu0 %2107 }
0x1e79   :  { %v2115_v16 = vmul.f32 0.03125, %v2108_v51 }
0x1e7a   :  { %v2111_v17 = vpop.xlane.xlu1 %2110 }
0x1e7b   :  { %v2118_v18 = vadd.f32 1e-05, %v2115_v16  ;;  %v2116_v53 = vmul.f32 0.03125, %v2111_v17 }
0x1e7c   :  { %v2114_v19 = vpop.xlane.xlu0 %2113 }
0x1e7d   :  { %3050 = vrsqrt.f32 %v2118_v18  ;;  %v2119_v20 = vadd.f32 1e-05, %v2116_v53  ;;  %v2117_v21 = vmul.f32 0.03125, %v2114_v19  ;;  %v2570_v19 = vld [vmem:[%s3733_s5 + $0x14] ss:$0 sm:$0xff] }
0x1e7f   :  { %3052 = vrsqrt.f32 %v2119_v20  ;;  %v2120_v46 = vadd.f32 1e-05, %v2117_v21 }
0x1e81   :  { %3054 = vrsqrt.f32 %v2120_v46 }
0x1e87   :  { %v3051_v22 = vpop.eup %3050 }
0x1e88   :  { %v2124_v24 = vmul.f32 %v3051_v22, %v2100_v8 }
0x1e89   :  { %v3053_v26 = vpop.eup %3052 }
0x1e8a   :  { %v2125_v27 = vmul.f32 %v3053_v26, %v2101_v10  ;;  %v2131_v28 = vmul.f32 %v2563_v23, %v2124_v24 }
0x1e8b   :  { %v3055_v29 = vpop.eup %3054 }
0x1e8c   :  { %v2126_v31 = vmul.f32 %v3055_v29, %v2102_v45  ;;  %v2132_v32 = vmul.f32 %v2563_v23, %v2125_v27  ;;  %v2138_v33 = vadd.f32 %v2564_v30, %v2131_v28 }
0x1e8e   :  { %v2139_v37 = vadd.f32 %v2564_v30, %v2132_v32  ;;  %v2133_v42 = vmul.f32 %v2563_v23, %v2126_v31 }
0x1e90   :  { %v2141_v47 = vpack.c.bf16 %v2139_v37, %v2138_v33  ;;  %v2140_v48 = vadd.f32 %v2564_v30, %v2133_v42 }
0x1e92   :  { %2864 = vmatprep.mubr.msk.bf16.mxu0 %vm184_vm2, %v2141_v47  ;;  %v2142_v49 = vpack.c.bf16 %v2140_v48, %v2140_v48 }
0x1e94   :  { %2865 = vmatmul.mubr.msk.bf16.vlgmr.msra.gmra.mrb[40].mxu0 %vm184_vm2, %v2142_v49 }
0x1f67   :  { %v2866_v43 = vpop.f32.mrb[40].mxu0 }
0x1f68   :  { %v2213_v61 = vadd.f32 %v2866_v43, %v2565_v60  ;;  %v2204_v41 = vpop.f32.mrb[41].mxu0 }
0x1f69   :  { %v2205_v14 = vadd.f32 %v2565_v60, %v2204_v41  ;;  %v2867_v62 = vpop.f32.mrb[42].mxu0  ;;  %v2973_v41 = vld [vmem:[%s3731_s4 + $0x134] sm:$0xff]  }
0x1f6a   :  { %v2220_v63 = vmul.f32 %v2213_v61, %v2213_v61  ;;  %v2207_v54 = vpop.f32.mrb[43].mxu0 }
0x1f6b   :  { %v2218_v0 = vmul.f32 %v2205_v14, %v2205_v14  ;;  %v2208_v1 = vadd.f32 %v2565_v60, %v2207_v54 }
0x1f6c   :  { %v2223_v59 = vmul.f32 %v2220_v63, %v2213_v61 }
0x1f6d   :  { %v2221_v4 = vmul.f32 %v2218_v0, %v2205_v14  ;;  %v2219_v56 = vmul.f32 %v2208_v1, %v2208_v1 }
0x1f6e   :  { %v2226_v5 = vmul.f32 0.044715, %v2223_v59 }
0x1f6f   :  { %v2224_v50 = vmul.f32 0.044715, %v2221_v4  ;;  %v2222_v6 = vmul.f32 %v2219_v56, %v2208_v1 }
0x1f70   :  { %v2229_v7 = vadd.f32 %v2226_v5, %v2213_v61 }
0x1f71   :  { %v2227_v44 = vadd.f32 %v2224_v50, %v2205_v14  ;;  %v2225_v8 = vmul.f32 0.044715, %v2222_v6  ;;  %v2577_v50 = vld [vmem:[%s3733_s5 + $0x16] ss:$0 sm:$0xff] }
0x1f72   :  { %v2232_v9 = vmul.f32 0.7978846, %v2229_v7 }
0x1f73   :  { %v2230_v34 = vmul.f32 0.7978846, %v2227_v44  ;;  %v2228_v10 = vadd.f32 %v2225_v8, %v2208_v1 }
0x1f74   :  { %3056 = vtanh.f32 %v2232_v9 }
0x1f75   :  { %3058 = vtanh.f32 %v2230_v34  ;;  %v2231_v11 = vmul.f32 0.7978846, %v2228_v10  ;;  %v2578_v34 = vld [vmem:[%s3733_s5 + $0x17] ss:$0 sm:$0xff] }
0x1f77   :  { %3060 = vtanh.f32 %v2231_v11 }
0x1f7e   :  { %v3057_v12 = vpop.eup %3056 }
0x1f7f   :  { %v3059_v45 = vpop.eup %3058  ;;  %v2238_v36 = vadd.f32 1.0, %v3057_v12 }
0x1f80   :  { %v2236_v38 = vadd.f32 1.0, %v3059_v45 }
0x1f81   :  { %v3061_v40 = vpop.eup %3060  ;;  %v2241_v35 = vmul.f32 0.5, %v2238_v36 }
0x1f82   :  { %v2239_v39 = vmul.f32 0.5, %v2236_v38  ;;  %v2237_v13 = vadd.f32 1.0, %v3061_v40 }
0x1f83   :  { %v2244_v51 = vmul.f32 %v2241_v35, %v2213_v61  ;;  %v2972_v61 = vld [vmem:[%s3731_s4 + $0x12c] sm:$0xff]  }
0x1f84   :  { %v2240_v15 = vmul.f32 0.5, %v2237_v13  ;;  %v2242_v16 = vmul.f32 %v2239_v39, %v2205_v14  ;;  %2880 = vmatprep.subr.bf16.mxu0 %v2972_v61  ;;  %v2579_v39 = vld [vmem:[%s3733_s5 + $0x18] ss:$0 sm:$0xff] }
0x1f85   :  { %v2246_v53 = vpack.c.bf16 %v2244_v51, %v2244_v51  ;;  %2881 = vmatpush3.bf16.msra.mxu0 %v2972_v61 }
0x1f86   :  { %v2243_v17 = vmul.f32 %v2240_v15, %v2208_v1  ;;  %2882 = vmatprep.subr.bf16.mxu0 %v2973_v41 }
0x1f88   :  { %v2245_v18 = vpack.c.bf16 %v2243_v17, %v2242_v16 }
0x1f89   :  { %2883 = vmatpush3.bf16.msra.mxu0 %v2973_v41 }
0x1f8a   :  { %2876 = vmatprep.mubr.msk.bf16.mxu1 %vm129_vm0, %v2245_v18 }
0x1f8b   :  { %2877 = vmatmul.mubr.msk.bf16.vlgmr.msra.gmra.mrb[60].mxu1 %vm129_vm0, %v2246_v53 }
0x205e   :  { %v2878_v20 = vpop.f32.mrb[60].mxu1 }
0x205f   :  { %v2324_v21 = vpop.f32.mrb[61].mxu1  ;;  %v2333_v46 = vadd.f32 %v2878_v20, %v2570_v19 }
0x2060   :  { %v2325_v22 = vadd.f32 %v2570_v19, %v2324_v21  ;;  %v2879_v23 = vpop.f32.mrb[62].mxu1 }
0x2061   :  { %v2327_v24 = vpop.f32.mrb[63].mxu1  ;;  %v2340_v28 = vadd.f32 %v2333_v46, %v3642_v2 }
0x2062   :  { %v2338_v26 = vadd.f32 %v2325_v22, %v3645_v3  ;;  %v2328_v27 = vadd.f32 %v2570_v19, %v2327_v24 }
0x2063   :  { %v2349_v32 = vsel %vm184_vm2, %v2340_v28, 0.0 }
0x2064   :  { %v2343_v29 = vsel %vm184_vm2, %v2338_v26, 0.0  ;;  %v2339_v30 = vadd.f32 %v2328_v27, %v3648_v55 }
0x2065   :  { %2344 = vadd.xlane.f32.xlu1 %v2343_v29 }
0x2066   :  { %v2346_v31 = vsel %vm184_vm2, %v2339_v30, 0.0 }
0x2067   :  { %2347 = vadd.xlane.f32.xlu0 %v2346_v31 }
0x2069   :  { %2350 = vadd.xlane.f32.xlu1 %v2349_v32 }
0x20f2   :  { %v2345_v33 = vpop.xlane.xlu1 %2344 }
0x20f3   :  { %v2352_v37 = vmul.f32 0.03125, %v2345_v33 }
0x20f4   :  { %v2348_v42 = vpop.xlane.xlu0 %2347 }
0x20f5   :  { %v2355_v47 = vsub.f32 %v2338_v26, %v2352_v37  ;;  %v2353_v48 = vmul.f32 0.03125, %v2348_v42 }
0x20f6   :  { %v2351_v3 = vpop.xlane.xlu1 %2350 }
0x20f7   :  { %v2356_v49 = vsub.f32 %v2339_v30, %v2353_v48  ;;  %v2354_v25 = vmul.f32 0.03125, %v2351_v3  ;;  %v2358_v2 = vmul.f32 %v2355_v47, %v2355_v47 }
0x20f9   :  { %v2357_v52 = vsub.f32 %v2340_v28, %v2354_v25  ;;  %v2361_v57 = vsel %vm184_vm2, %v2358_v2, 0.0  ;;  %v2359_v55 = vmul.f32 %v2356_v49, %v2356_v49 }
0x20fa   :  { %2362 = vadd.xlane.f32.xlu0 %v2361_v57 }
0x20fb   :  { %v2364_v58 = vsel %vm184_vm2, %v2359_v55, 0.0  ;;  %v2360_v60 = vmul.f32 %v2357_v52, %v2357_v52 }
0x20fc   :  { %2365 = vadd.xlane.f32.xlu1 %v2364_v58 }
0x20fd   :  { %v2367_v43 = vsel %vm184_vm2, %v2360_v60, 0.0 }
0x20fe   :  { %2368 = vadd.xlane.f32.xlu0 %v2367_v43 }
0x2187   :  { %v2363_v14 = vpop.xlane.xlu0 %2362 }
0x2188   :  { %v2370_v62 = vmul.f32 0.03125, %v2363_v14 }
0x2189   :  { %v2366_v63 = vpop.xlane.xlu1 %2365 }
0x218a   :  { %v2373_v54 = vadd.f32 1e-05, %v2370_v62  ;;  %v2371_v0 = vmul.f32 0.03125, %v2366_v63 }
0x218b   :  { %v2369_v1 = vpop.xlane.xlu0 %2368 }
0x218c   :  { %3062 = vrsqrt.f32 %v2373_v54  ;;  %v2374_v59 = vadd.f32 1e-05, %v2371_v0  ;;  %v2372_v4 = vmul.f32 0.03125, %v2369_v1 }
0x218e   :  { %3064 = vrsqrt.f32 %v2374_v59  ;;  %v2375_v56 = vadd.f32 1e-05, %v2372_v4 }
0x2190   :  { %3066 = vrsqrt.f32 %v2375_v56 }
0x2196   :  { %v3063_v5 = vpop.eup %3062 }
0x2197   :  { %v2379_v6 = vmul.f32 %v3063_v5, %v2355_v47 }
0x2198   :  { %v3065_v7 = vpop.eup %3064 }
0x2199   :  { %v2380_v44 = vmul.f32 %v3065_v7, %v2356_v49  ;;  %v2386_v8 = vmul.f32 %v2577_v50, %v2379_v6 }
0x219a   :  { %v3067_v9 = vpop.eup %3066 }
0x219b   :  { %v2381_v10 = vmul.f32 %v3067_v9, %v2357_v52  ;;  %v2387_v11 = vmul.f32 %v2577_v50, %v2380_v44  ;;  %v2393_v45 = vadd.f32 %v2578_v34, %v2386_v8 }
0x219d   :  { %v2388_v12 = vmul.f32 %v2577_v50, %v2381_v10  ;;  %v2394_v36 = vadd.f32 %v2578_v34, %v2387_v11 }
0x219f   :  { %v2396_v38 = vpack.c.bf16 %v2394_v36, %v2393_v45  ;;  %v2395_v40 = vadd.f32 %v2578_v34, %v2388_v12 }
0x21a1   :  { %2884 = vmatprep.mubr.msk.bf16.mxu0 %vm184_vm2, %v2396_v38  ;;  %v2397_v35 = vpack.c.bf16 %v2395_v40, %v2395_v40 }
0x21a3   :  { %2885 = vmatmul.mubr.msk.bf16.vlgmr.msra.gmra.mrb[44].mxu0 %vm184_vm2, %v2397_v35 }
0x2276   :  { %v2886_v13 = vpop.f32.mrb[44].mxu0 }
0x2277   :  { %v2468_v15 = vadd.f32 %v2886_v13, %v2579_v39  ;;  %v2459_v51 = vpop.f32.mrb[45].mxu0 }
0x2278   :  { %v2460_v16 = vadd.f32 %v2579_v39, %v2459_v51  ;;  %v2887_v17 = vpop.f32.mrb[46].mxu0 }
0x2279   :  { %2475 = vst [vmem:[%s3737_s6 + $0x10] sm:$0xff] %v2468_v15  ;;  %v2462_v18 = vpop.f32.mrb[47].mxu0 }
0x227a   :  { %2473 = vst [vmem:[%s3737_s6] sm:$0xff] %v2460_v16  ;;  %v2463_v53 = vadd.f32 %v2579_v39, %v2462_v18 }
0x227c   :  { %2474 = vst [vmem:[%s3737_s6 + $0x8] sm:$0xff] %v2463_v53 }

</bundles_post_ra>
